<compile_context>
chip_gen: v7x
topology: tpu7x:2x2x1
jax: 0.10.0
libtpu: 0.0.40
codegen_flags: <defaults>
</compile_context>

<pallas_src>
import jax
import jax.numpy as jnp
from jax import lax
from jax.experimental import pallas as pl
from jax.experimental.pallas import tpu as pltpu

# ---------------- small config (scaled down from the original experiment) ----------------
BATCH = 2
MODEL_DIM = 32          # exp.model_dim      (orig 128)
N_FRAMES = 16           # exp.n_frames       (orig 128)
N_SAMPLES = 256         # exp.n_samples      (orig 2**15)
N_EVENTS = 4            # n_events           (orig 16)
POS_CH = 33             # pos_encoded(., ., 16) -> 1 + 2*16 channels
WINDOW = N_SAMPLES // N_FRAMES
IMPULSE_DIM = 32        # time latent / impulse resolution (orig 128)
N_BANDS = 8             # scale.n_bands      (orig larger)
RESOLUTION = 8          # SegmentGenerator.resolution (orig 32)
NOISE_FACTOR = 100000.0
DILATIONS = (1, 3, 9, 27, 1)
N_BLOCKS = len(DILATIONS)
WEIGHT_INIT = 0.05
ENV_OUT = 2 * N_FRAMES                       # 32
TF_OUT = RESOLUTION * N_BANDS                # 64
HEAD_OUT = IMPULSE_DIM + MODEL_DIM + IMPULSE_DIM   # 96 : [time | transfer | pos]
SLAB_OUT = HEAD_OUT + ENV_OUT                # 128 -> lane-dense output slab
# TODO(synk): DilatedStack source unavailable; PyTorch F.leaky_relu default slope is 0.01,
# many audio DilatedStack impls use 0.2 — kept at 0.2 to match the previous stand-in.
LEAKY_SLOPE = 0.2


# ---------------------------------- Pallas kernels ----------------------------------
def _inv_std(v):
    # TODO(synk): ExampleNorm not provided; per-example std normalization (no centering).
    m = jnp.mean(v)
    var = jnp.mean((v - m) ** 2)
    return lax.rsqrt(var + 1e-8)             # EUP rsqrt instead of VPU divide


def _encode_kernel(frames_ref, pos_ref, fbw_ref, fbb_ref,
                   rwf_ref, rwp_ref, rb_ref,
                   taps_ref, db_ref, cw_ref, cb_ref, h_ref):
    """Fused encode path for ONE batch element (grid=(B,), parallel).

    frames: (WINDOW, T)  pos: (33, T)  h stays resident in VMEM across all blocks.
    Per dilated block: ONE fused tap matmul  [Wl;Wc;Wr] @ h  (3D, T), then the left/right
    thirds are time-shifted.  Shift matrices are built from a 2-D iota in-kernel (no DMA).
    """
    f32 = jnp.float32
    bf16 = jnp.bfloat16
    D, T = MODEL_DIM, N_FRAMES

    # filterbank feature stand-in: channels-first projection + magnitude
    feats = jnp.abs(jnp.dot(fbw_ref[...], frames_ref[...].astype(bf16),
                            preferred_element_type=f32) + fbb_ref[...])
    feats = feats * _inv_std(feats)                      # ExampleNorm stand-in

    # `reduce` 1x1 conv over [feats ; pos] — concat avoided by splitting the weight
    h = (jnp.dot(rwf_ref[...], feats.astype(bf16), preferred_element_type=f32)
         + jnp.dot(rwp_ref[...], pos_ref[...], preferred_element_type=f32)
         + rb_ref[...])

    # time-shift matrices built once from iota (shared row/col planes, per-d compare)
    row = lax.broadcasted_iota(jnp.int32, (T, T), 0)
    col = lax.broadcasted_iota(jnp.int32, (T, T), 1)

    # dilated context stack (unrolled; weights VMEM-resident across all 5 blocks)
    # TODO(synk): at production scale (D=T=128) switch to lax.fori_loop(..., unroll=True)
    # or tile T to bound vreg live ranges, and replace the tiny (T,T) shift matmuls with
    # pltpu.roll(+/-d) + iota mask (lane-aligned at T=128) so the shift rides the XLU.
    for i, d in enumerate(DILATIONS):
        hb = h.astype(bf16)
        if d < T:
            taps = jnp.dot(taps_ref[i], hb, preferred_element_type=f32)   # (3D, T)
            a_l = taps[:D]
            a_c = taps[D:2 * D]
            a_r = taps[2 * D:]
            sl = (row == col - d).astype(f32)     # out[:, t] = a[:, t-d]  (zero pad)
            sr = (row == col + d).astype(f32)     # out[:, t] = a[:, t+d]  (zero pad)
            y = (a_c
                 + jnp.dot(a_l, sl, preferred_element_type=f32)
                 + jnp.dot(a_r, sr, preferred_element_type=f32)
                 + db_ref[i])
        else:
            # dilation >= T: left/right taps are exactly zero (zero padding) — skip them.
            y = jnp.dot(taps_ref[i, D:2 * D], hb, preferred_element_type=f32) + db_ref[i]
        z = jnp.dot(cw_ref[i], y.astype(bf16), preferred_element_type=f32) + cb_ref[i] + h
        h = jnp.where(z > 0, z, LEAKY_SLOPE * z)

    h_ref[...] = h * _inv_std(h)                         # ExampleNorm stand-in


def encode_stack(frames_t, pos2d, params):
    B = frames_t.shape[0]
    D, T, NB = MODEL_DIM, N_FRAMES, N_BLOCKS
    # TODO(synk): on 1-TC v5e/v6e collapse grid=(B,) to one invocation (fold B into the
    # time axis) to remove serial per-batch grid overhead; keep the parallel batch grid
    # on 2-TC v7x so both TensorCores get work.
    return pl.pallas_call(
        _encode_kernel,
        out_shape=jax.ShapeDtypeStruct((B, D, T), jnp.float32),
        grid=(B,),
        in_specs=[
            pl.BlockSpec((None, WINDOW, T), lambda b: (b, 0, 0)),   # frames (per batch)
            pl.BlockSpec((POS_CH, T), lambda b: (0, 0)),            # pos encoding (bf16)
            pl.BlockSpec((D, WINDOW), lambda b: (0, 0)),            # fb_w (bf16)
            pl.BlockSpec((D, 1), lambda b: (0, 0)),                 # fb_b
            pl.BlockSpec((D, D), lambda b: (0, 0)),                 # reduce_w (feat, bf16)
            pl.BlockSpec((D, POS_CH), lambda b: (0, 0)),            # reduce_w (pos, bf16)
            pl.BlockSpec((D, 1), lambda b: (0, 0)),                 # reduce_b
            pl.BlockSpec((NB, 3 * D, D), lambda b: (0, 0, 0)),      # fused taps [Wl;Wc;Wr]
            pl.BlockSpec((NB, D, 1), lambda b: (0, 0, 0)),          # ctx_db
            pl.BlockSpec((NB, D, D), lambda b: (0, 0, 0)),          # ctx_cw (bf16)
            pl.BlockSpec((NB, D, 1), lambda b: (0, 0, 0)),          # ctx_cb
        ],
        out_specs=pl.BlockSpec((None, D, T), lambda b: (b, 0, 0)),
        compiler_params=pltpu.CompilerParams(dimension_semantics=("parallel",)),
    )(frames_t, pos2d, params["fb_w"], params["fb_b"],
      params["reduce_w_feat"], params["reduce_w_pos"], params["reduce_b"],
      params["ctx_w_taps"], params["ctx_db"], params["ctx_cw"], params["ctx_cb"])


def _head_kernel(x_ref, hw_ref, hb_ref, sw_ref, sb_ref, gs_ref, bank_ref,
                 slab_ref, sig_ref):
    """Fused event/segment head:
       [to_time | to_transfer | (to_time∘to_pos)]  ->  [env | transfer-logits]
       -> per-band softmax -> resonance-bank mix.  Everything stays in VMEM.
       Outputs: lane-dense (M, 128) slab  [time | transfer | pos | env]  and (M, N) signal.
    """
    f32 = jnp.float32
    bf16 = jnp.bfloat16
    xb = x_ref[...].astype(bf16)
    # fused [time | transfer | pos] matmul (to_pos pre-composed into head_wt at init)
    y1 = jnp.dot(xb, hw_ref[...], preferred_element_type=f32) + hb_ref[...]    # (M, 96)
    transfer = y1[:, IMPULSE_DIM:IMPULSE_DIM + MODEL_DIM]

    # fused env(sigmoid) + transfer heads (VQ is passthrough in the original)
    y2 = jnp.dot(transfer.astype(bf16), sw_ref[...],
                 preferred_element_type=f32) + sb_ref[...]                      # (M, 96)
    env = jax.nn.sigmoid(y2[:, :ENV_OUT])
    tf_logits = y2[:, ENV_OUT:]          # columns already in (band, resolution) order

    # per-band softmax over RESOLUTION, done without reshape/transpose:
    # subtracting the per-row max is constant within every group -> softmax unchanged;
    # per-group sums are recovered with a block-diagonal ones matmul.
    m = jnp.max(tf_logits, axis=-1, keepdims=True)
    e = jnp.exp(tf_logits - m)
    denom = jnp.dot(e, gs_ref[...], preferred_element_type=f32)
    tf_soft = e * pl.reciprocal(denom, approx=True)

    # resonance-bank mix (TransferFunction stand-in), bf16 operands, f32 accumulate
    sig_ref[...] = jnp.dot(tf_soft.astype(bf16), bank_ref[...],
                           preferred_element_type=f32)

    # lane-dense (M, 128) slab; split in the JAX wrapper
    slab_ref[:, :HEAD_OUT] = y1
    slab_ref[:, HEAD_OUT:] = env


def fused_head(flat, params):
    M = flat.shape[0]
    # TODO(synk): at the original n_samples=2**15, tile the N axis of bank/sig
    # (grid=(N//tn,), tn ~ 2048-4096 on v7x / 4096-8192 on v6e), keep bank bf16 and set
    # pltpu.CompilerParams(vmem_limit_bytes=...) so double-buffered blocks fit VMEM.
    return pl.pallas_call(
        _head_kernel,
        out_shape=(jax.ShapeDtypeStruct((M, SLAB_OUT), jnp.float32),
                   jax.ShapeDtypeStruct((M, N_SAMPLES), jnp.float32)),
        grid=(1,),
        in_specs=[
            pl.BlockSpec((M, MODEL_DIM), lambda i: (0, 0)),               # flat events
            pl.BlockSpec((MODEL_DIM, HEAD_OUT), lambda i: (0, 0)),        # head_wt (bf16)
            pl.BlockSpec((1, HEAD_OUT), lambda i: (0, 0)),                # head_b
            pl.BlockSpec((MODEL_DIM, ENV_OUT + TF_OUT), lambda i: (0, 0)),  # seg_wt (bf16)
            pl.BlockSpec((1, ENV_OUT + TF_OUT), lambda i: (0, 0)),        # seg_b
            pl.BlockSpec((TF_OUT, TF_OUT), lambda i: (0, 0)),             # group-sum ones
            pl.BlockSpec((TF_OUT, N_SAMPLES), lambda i: (0, 0)),          # bank (bf16)
        ],
        out_specs=(pl.BlockSpec((M, SLAB_OUT), lambda i: (0, 0)),
                   pl.BlockSpec((M, N_SAMPLES), lambda i: (0, 0))),
    )(flat, params["head_wt"], params["head_b"], params["seg_wt"], params["seg_b"],
      params["group_sum"], params["bank_wt"])


def _event_sum_kernel(x_ref, o_ref):
    # x: (E, tn) -> o: (1, tn) : torch.sum(x, dim=1, keepdim=True)
    o_ref[...] = jnp.sum(x_ref[...], axis=0, keepdims=True)


def event_sum(x):
    B, E, N = x.shape
    # TODO(synk): at production N=2**15 raise tn to 4096-8192 (v6e) / 2048-4096 (v7x) —
    # the op is purely HBM-bound, bigger lane-dense tiles amortize per-step overhead.
    tn = min(N, 2048)
    assert N % tn == 0
    return pl.pallas_call(
        _event_sum_kernel,
        out_shape=jax.ShapeDtypeStruct((B, 1, N), jnp.float32),
        grid=(B, N // tn),
        in_specs=[pl.BlockSpec((None, E, tn), lambda b, n: (b, 0, n))],
        out_specs=pl.BlockSpec((None, 1, tn), lambda b, n: (b, 0, n)),
        compiler_params=pltpu.CompilerParams(
            dimension_semantics=("parallel", "parallel")),
    )(x)


# ---------------------------------- glue helpers ----------------------------------
def fft_convolve(env, tf):
    # exact port of fft_convolve (rfft/irfft norm='ortho', pad to 2N, truncate to N)
    # TODO(synk): FFT has no Pallas/Mosaic primitive; done in plain JAX.
    n = env.shape[-1]
    pad = [(0, 0)] * (env.ndim - 1) + [(0, n)]
    env_p = jnp.pad(env, pad)
    tf_p = jnp.pad(tf, pad)
    env_spec = jnp.fft.rfft(env_p, axis=-1, norm="ortho")
    tf_spec = jnp.fft.rfft(tf_p, axis=-1, norm="ortho")
    final = jnp.fft.irfft(env_spec * tf_spec, axis=-1, norm="ortho")
    return final[..., :n]


def exp_softmax(x, key):
    # F.gumbel_softmax(exp(x), tau=1, hard=True) -- gumbel noise drawn from `key`.
    # NOTE: exp-before-softmax matches the original module; jax.nn.softmax is max-shifted
    # so the softmax itself is stable (exp(x) can still saturate for large x, as in torch).
    logits = jnp.exp(x)
    g = jax.random.gumbel(key, x.shape, dtype=x.dtype)
    soft = jax.nn.softmax(logits + g, axis=-1)
    hard = jax.nn.one_hot(jnp.argmax(soft, axis=-1), x.shape[-1], dtype=x.dtype)
    return hard + soft - jax.lax.stop_gradient(soft)  # straight-through; forward == hard


def pos_encoded_2d(time, n_freqs):
    pos = jnp.linspace(-1.0, 1.0, time).astype(jnp.float32)
    feats = [pos[None, :]]
    for i in range(n_freqs):
        feats.append(jnp.sin(pos[None, :] * (2.0 ** i) * jnp.pi))
        feats.append(jnp.cos(pos[None, :] * (2.0 ** i) * jnp.pi))
    return jnp.concatenate(feats, axis=0)            # (1 + 2*n_freqs, time)


def vectorwise_sparsity(x, keep):
    # TODO(synk): VectorwiseSparsity not provided; top-k by vector norm + unit-normalize.
    norms = jnp.linalg.norm(x, axis=1)                 # (B, T)
    idx = jnp.argsort(-norms, axis=-1)[:, :keep]       # (B, keep)
    xt = jnp.transpose(x, (0, 2, 1))                   # (B, T, D)
    gathered = jnp.take_along_axis(xt, idx[..., None], axis=1)   # (B, keep, D)
    normed = gathered / (jnp.linalg.norm(gathered, axis=-1, keepdims=True) + 1e-8)
    return normed, idx


def impulse_generator(pos_logits, key):
    # TODO(synk): ImpulseGenerator not provided; hard selection -> impulse placed at
    # position argmax * (n_samples // IMPULSE_DIM).
    sel = exp_softmax(pos_logits, key)                 # (M, IMPULSE_DIM) one-hot
    step = N_SAMPLES // IMPULSE_DIM
    imp = jnp.concatenate(
        [sel[..., None], jnp.zeros(sel.shape + (step - 1,), sel.dtype)], axis=-1)
    return imp.reshape(sel.shape[0], N_SAMPLES)


# ---------------------------------- Summarizer forward ----------------------------------
def summarizer_forward(params, x, rng):
    key_gumbel, key_noise = jax.random.split(rng)
    batch = x.shape[0]

    # ---- encode (single fused Pallas kernel) ----
    frames_t = jnp.transpose(x.reshape(batch, N_FRAMES, WINDOW), (0, 2, 1))  # (B, W, T)
    pos2d = pos_encoded_2d(N_FRAMES, 16).astype(jnp.bfloat16)                # (33, T)
    h = encode_stack(frames_t, pos2d, params)                                # (B, D, T)

    vecs, indices = vectorwise_sparsity(h, N_EVENTS)                         # (B, E, D)
    encoded = vecs
    flat = vecs.reshape(-1, MODEL_DIM)                                       # (B*E, D)
    M = flat.shape[0]

    # ---- fused event + segment heads (one Pallas kernel, lane-dense outputs) ----
    slab, tf_sig = fused_head(flat, params)
    orig_time = slab[:, :IMPULSE_DIM]                                        # (M, 32)
    orig_transfer = slab[:, IMPULSE_DIM:IMPULSE_DIM + MODEL_DIM]             # (M, 32)
    pos_latent = slab[:, IMPULSE_DIM + MODEL_DIM:HEAD_OUT]                   # (M, 32)
    env = slab[:, HEAD_OUT:]                                                 # (M, 32)

    time = pos_latent.reshape(-1, 1, IMPULSE_DIM)
    impulse = impulse_generator(pos_latent, key_gumbel)
    impulse = impulse.reshape(batch, N_EVENTS, N_SAMPLES)
    t_loss = jnp.float32(0.0)
    transfer, tf_indices, tf_loss = orig_transfer, None, jnp.float32(0.0)    # VQ passthrough

    # ---- segment render glue (interp / noise / FFT in plain JAX) ----
    orig_env = env.reshape(M, 1, ENV_OUT)
    # TODO(synk): F.interpolate(mode='linear', align_corners=False) approximated
    # with jax.image.resize(method='linear').
    env_up = jax.image.resize(orig_env, (M, 1, N_SAMPLES), method="linear")
    noise = jax.random.uniform(key_noise, (1, 1, N_SAMPLES),
                               minval=-1.0, maxval=1.0, dtype=jnp.float32) * NOISE_FACTOR
    env_up = env_up * noise
    final = fft_convolve(env_up, tf_sig.reshape(M, 1, N_SAMPLES))            # (M, 1, N)
    final = jnp.mean(final, axis=1, keepdims=True)     # no-op (n_inflections=1), as original
    seg = final.reshape(batch, N_EVENTS, N_SAMPLES)

    rendered = fft_convolve(seg, impulse)
    output = event_sum(rendered)                                             # Pallas reduction
    loss = t_loss + tf_loss
    tf = None                                                                # orig_tf is None

    return (output, indices, encoded, env.reshape(batch, N_EVENTS, -1),
            loss, tf, time, transfer, orig_time, orig_transfer)


# ---------------------------------- parameters ----------------------------------
def make_bank():
    t = jnp.linspace(0.0, 1.0, N_SAMPLES).astype(jnp.float32)
    freqs = 2.0 * jnp.pi * jnp.linspace(2.0, float(N_SAMPLES // 4), N_BANDS).astype(jnp.float32)
    decays = jnp.linspace(2.0, 30.0, RESOLUTION).astype(jnp.float32)
    bank = (jnp.exp(-decays[None, :, None] * t[None, None, :])
            * jnp.sin(freqs[:, None, None] * t[None, None, :]))
    return bank.reshape(N_BANDS * RESOLUTION, N_SAMPLES)   # rows in (band, resolution) order


def init_params(key):
    def w(k, shape):
        return jax.random.normal(k, shape, dtype=jnp.float32) * WEIGHT_INIT

    bf16 = jnp.bfloat16
    ks = jax.random.split(key, 10)
    D = MODEL_DIM

    # filterbank projection stand-in (channels-first: feats = |fb_w @ frames|)
    fb_w = w(ks[0], (D, WINDOW)).astype(bf16)
    fb_b = jnp.zeros((D, 1), jnp.float32)

    # reduce 1x1 conv, split into feat / pos column blocks (avoids in-kernel concat)
    reduce_w = w(ks[1], (D, D + POS_CH))
    reduce_w_feat = reduce_w[:, :D].astype(bf16)
    reduce_w_pos = reduce_w[:, D:].astype(bf16)
    reduce_b = jnp.zeros((D, 1), jnp.float32)

    # dilated context stack: per block, one fused tap matrix [Wl; Wc; Wr] (3D, D)
    kctx = jax.random.split(ks[7], N_BLOCKS * 2)
    taps = []
    for i in range(N_BLOCKS):
        dw = w(kctx[2 * i], (D, 3 * D))                         # columns [left|center|right]
        taps.append(jnp.concatenate([dw[:, :D], dw[:, D:2 * D], dw[:, 2 * D:]], axis=0))
    ctx_w_taps = jnp.stack(taps).astype(bf16)                   # (NB, 3D, D)
    ctx_cw = jnp.stack([w(kctx[2 * i + 1], (D, D)) for i in range(N_BLOCKS)]).astype(bf16)
    ctx_db = jnp.zeros((N_BLOCKS, D, 1), jnp.float32)
    ctx_cb = jnp.zeros((N_BLOCKS, D, 1), jnp.float32)

    # event head: [to_time | to_transfer | to_time@to_pos] fused & pre-transposed at init
    to_time_w = w(ks[2], (IMPULSE_DIM, D))
    to_transfer_w = w(ks[4], (D, D))
    to_pos_wt = w(ks[3], (IMPULSE_DIM, IMPULSE_DIM)).T
    pos_cols = to_time_w.T @ to_pos_wt                           # pre-composed to_pos (bias=0)
    head_wt = jnp.concatenate([to_time_w.T, to_transfer_w.T, pos_cols], axis=1).astype(bf16)
    head_b = jnp.zeros((1, HEAD_OUT), jnp.float32)

    # segment heads (env + transfer), fused; tf columns permuted at init to (band, resolution)
    env_w = w(ks[5], (ENV_OUT, D))
    tf_w = w(ks[6], (TF_OUT, D))                                 # rows (resolution, band)
    tf_w_perm = tf_w.reshape(RESOLUTION, N_BANDS, D).transpose(1, 0, 2).reshape(TF_OUT, D)
    seg_wt = jnp.concatenate([env_w.T, tf_w_perm.T], axis=1).astype(bf16)
    seg_b = jnp.zeros((1, ENV_OUT + TF_OUT), jnp.float32)

    # block-diagonal ones for the grouped (per-band) softmax denominator
    g = jnp.arange(TF_OUT) // RESOLUTION
    group_sum = (g[:, None] == g[None, :]).astype(jnp.float32)   # (TF_OUT, TF_OUT)

    return {
        "fb_w": fb_w, "fb_b": fb_b,
        "reduce_w_feat": reduce_w_feat, "reduce_w_pos": reduce_w_pos, "reduce_b": reduce_b,
        "ctx_w_taps": ctx_w_taps, "ctx_db": ctx_db, "ctx_cw": ctx_cw, "ctx_cb": ctx_cb,
        "head_wt": head_wt, "head_b": head_b,
        "seg_wt": seg_wt, "seg_b": seg_b,
        "group_sum": group_sum,
        "bank_wt": make_bank().astype(bf16),
    }


# ---------------------------------- main ----------------------------------
if __name__ == "__main__":
    key = jax.random.PRNGKey(0)
    k_param, k_x, k_run = jax.random.split(key, 3)
    params = init_params(k_param)
    x = jax.random.normal(k_x, (BATCH, N_SAMPLES), dtype=jnp.float32)

    fwd = jax.jit(summarizer_forward)
    out = fwd(params, x, k_run)
    jax.block_until_ready(out)

    output = out[0]
    assert output.shape == (BATCH, 1, N_SAMPLES), output.shape
    print("KERNEL_OK")
</pallas_src>

<mosaic_0001>
module attributes {stable_mosaic.version = 11 : i64} {
  func.func @_encode_kernel(%arg0: i32, %arg1: memref<1x16x16xf32, #tpu.memory_space<vmem>>, %arg2: memref<33x16xbf16, #tpu.memory_space<vmem>>, %arg3: memref<32x16xbf16, #tpu.memory_space<vmem>>, %arg4: memref<32x1xf32, #tpu.memory_space<vmem>>, %arg5: memref<32x32xbf16, #tpu.memory_space<vmem>>, %arg6: memref<32x33xbf16, #tpu.memory_space<vmem>>, %arg7: memref<32x1xf32, #tpu.memory_space<vmem>>, %arg8: memref<5x96x32xbf16, #tpu.memory_space<vmem>>, %arg9: memref<5x32x1xf32, #tpu.memory_space<vmem>>, %arg10: memref<5x32x32xbf16, #tpu.memory_space<vmem>>, %arg11: memref<5x32x1xf32, #tpu.memory_space<vmem>>, %arg12: memref<1x32x16xf32, #tpu.memory_space<vmem>>) attributes {dimension_semantics = [#tpu.dimension_semantics<parallel>], iteration_bounds = array<i64: 2>, scalar_prefetch = 0 : i64, scratch_operands = 0 : i64, tpu.core_type = #tpu.core_type<tc>, window_params = [{transform_indices = @transform_0, window_bounds = array<i64: 1, 16, 16>}, {pipeline_mode = #tpu.pipeline_mode<synchronous>, transform_indices = @transform_1, window_bounds = array<i64: 33, 16>}, {pipeline_mode = #tpu.pipeline_mode<synchronous>, transform_indices = @transform_2, window_bounds = array<i64: 32, 16>}, {pipeline_mode = #tpu.pipeline_mode<synchronous>, transform_indices = @transform_3, window_bounds = array<i64: 32, 1>}, {pipeline_mode = #tpu.pipeline_mode<synchronous>, transform_indices = @transform_4, window_bounds = array<i64: 32, 32>}, {pipeline_mode = #tpu.pipeline_mode<synchronous>, transform_indices = @transform_5, window_bounds = array<i64: 32, 33>}, {pipeline_mode = #tpu.pipeline_mode<synchronous>, transform_indices = @transform_6, window_bounds = array<i64: 32, 1>}, {pipeline_mode = #tpu.pipeline_mode<synchronous>, transform_indices = @transform_7, window_bounds = array<i64: 5, 96, 32>}, {pipeline_mode = #tpu.pipeline_mode<synchronous>, transform_indices = @transform_8, window_bounds = array<i64: 5, 32, 1>}, {pipeline_mode = #tpu.pipeline_mode<synchronous>, transform_indices = @transform_9, window_bounds = array<i64: 5, 32, 32>}, {pipeline_mode = #tpu.pipeline_mode<synchronous>, transform_indices = @transform_10, window_bounds = array<i64: 5, 32, 1>}, {transform_indices = @transform_11, window_bounds = array<i64: 1, 32, 16>}]} {
    %c0 = arith.constant 0 : index
    %c0_0 = arith.constant 0 : index
    %0 = vector.load %arg3[%c0, %c0_0] : memref<32x16xbf16, #tpu.memory_space<vmem>>, vector<32x16xbf16>
    %c0_1 = arith.constant 0 : index
    %c0_2 = arith.constant 0 : index
    %c0_3 = arith.constant 0 : index
    %1 = vector.load %arg1[%c0_1, %c0_2, %c0_3] : memref<1x16x16xf32, #tpu.memory_space<vmem>>, vector<1x16x16xf32>
    %2 = vector.shape_cast %1 : vector<1x16x16xf32> to vector<16x16xf32>
    %3 = arith.truncf %2 : vector<16x16xf32> to vector<16x16xbf16>
    %cst = arith.constant dense<0.000000e+00> : vector<32x16xf32>
    %4 = tpu.matmul %0, %3, %cst {dimension_numbers = #tpu.dot_dimension_numbers<[1], [0], [0], [1], [0, 0, 1, 1], [], []>} : vector<32x16xbf16>, vector<16x16xbf16>, vector<32x16xf32> -> vector<32x16xf32>
    %c0_4 = arith.constant 0 : index
    %c0_5 = arith.constant 0 : index
    %5 = vector.load %arg4[%c0_4, %c0_5] : memref<32x1xf32, #tpu.memory_space<vmem>>, vector<32x1xf32>
    %6 = vector.broadcast %5 : vector<32x1xf32> to vector<32x16xf32>
    %7 = arith.addf %4, %6 : vector<32x16xf32>
    %8 = math.absf %7 : vector<32x16xf32>
    %9 = vector.shape_cast %8 : vector<32x16xf32> to vector<1x32x16xf32>
    %cst_6 = arith.constant dense<0.000000e+00> : vector<1xf32>
    %10 = vector.multi_reduction <add>, %9, %cst_6 [1, 2] : vector<1x32x16xf32> to vector<1xf32>
    %11 = vector.shape_cast %10 : vector<1xf32> to vector<1x1x1xf32>
    %12 = vector.extract %11[0, 0, 0] : f32 from vector<1x1x1xf32>
    %cst_7 = arith.constant 5.120000e+02 : f32
    %13 = arith.divf %12, %cst_7 : f32
    %14 = vector.broadcast %13 : f32 to vector<32x16xf32>
    %15 = arith.subf %8, %14 : vector<32x16xf32>
    %16 = arith.mulf %15, %15 : vector<32x16xf32>
    %17 = vector.shape_cast %16 : vector<32x16xf32> to vector<1x32x16xf32>
    %cst_8 = arith.constant dense<0.000000e+00> : vector<1xf32>
    %18 = vector.multi_reduction <add>, %17, %cst_8 [1, 2] : vector<1x32x16xf32> to vector<1xf32>
    %19 = vector.shape_cast %18 : vector<1xf32> to vector<1x1x1xf32>
    %20 = vector.extract %19[0, 0, 0] : f32 from vector<1x1x1xf32>
    %cst_9 = arith.constant 5.120000e+02 : f32
    %21 = arith.divf %20, %cst_9 : f32
    %cst_10 = arith.constant 9.99999993E-9 : f32
    %22 = arith.addf %21, %cst_10 : f32
    %23 = math.rsqrt %22 : f32
    %24 = vector.broadcast %23 : f32 to vector<32x16xf32>
    %25 = arith.mulf %8, %24 : vector<32x16xf32>
    %c0_11 = arith.constant 0 : index
    %c0_12 = arith.constant 0 : index
    %26 = vector.load %arg5[%c0_11, %c0_12] : memref<32x32xbf16, #tpu.memory_space<vmem>>, vector<32x32xbf16>
    %27 = arith.truncf %25 : vector<32x16xf32> to vector<32x16xbf16>
    %cst_13 = arith.constant dense<0.000000e+00> : vector<32x16xf32>
    %28 = tpu.matmul %26, %27, %cst_13 {dimension_numbers = #tpu.dot_dimension_numbers<[1], [0], [0], [1], [0, 0, 1, 1], [], []>} : vector<32x32xbf16>, vector<32x16xbf16>, vector<32x16xf32> -> vector<32x16xf32>
    %c0_14 = arith.constant 0 : index
    %c0_15 = arith.constant 0 : index
    %29 = vector.load %arg6[%c0_14, %c0_15] : memref<32x33xbf16, #tpu.memory_space<vmem>>, vector<32x33xbf16>
    %c0_16 = arith.constant 0 : index
    %c0_17 = arith.constant 0 : index
    %30 = vector.load %arg2[%c0_16, %c0_17] : memref<33x16xbf16, #tpu.memory_space<vmem>>, vector<33x16xbf16>
    %cst_18 = arith.constant dense<0.000000e+00> : vector<32x16xf32>
    %31 = tpu.matmul %29, %30, %cst_18 {dimension_numbers = #tpu.dot_dimension_numbers<[1], [0], [0], [1], [0, 0, 1, 1], [], []>} : vector<32x33xbf16>, vector<33x16xbf16>, vector<32x16xf32> -> vector<32x16xf32>
    %32 = arith.addf %28, %31 : vector<32x16xf32>
    %c0_19 = arith.constant 0 : index
    %c0_20 = arith.constant 0 : index
    %33 = vector.load %arg7[%c0_19, %c0_20] : memref<32x1xf32, #tpu.memory_space<vmem>>, vector<32x1xf32>
    %34 = vector.broadcast %33 : vector<32x1xf32> to vector<32x16xf32>
    %35 = arith.addf %32, %34 : vector<32x16xf32>
    %36 = tpu.iota {dimensions = array<i32: 0>} : vector<16x16xi32>
    %37 = tpu.iota {dimensions = array<i32: 1>} : vector<16x16xi32>
    %38 = arith.truncf %35 : vector<32x16xf32> to vector<32x16xbf16>
    %c0_21 = arith.constant 0 : index
    %c0_22 = arith.constant 0 : index
    %c0_23 = arith.constant 0 : index
    %39 = vector.load %arg8[%c0_21, %c0_22, %c0_23] : memref<5x96x32xbf16, #tpu.memory_space<vmem>>, vector<1x96x32xbf16>
    %40 = vector.shape_cast %39 : vector<1x96x32xbf16> to vector<96x32xbf16>
    %cst_24 = arith.constant dense<0.000000e+00> : vector<96x16xf32>
    %41 = tpu.matmul %40, %38, %cst_24 {dimension_numbers = #tpu.dot_dimension_numbers<[1], [0], [0], [1], [0, 0, 1, 1], [], []>} : vector<96x32xbf16>, vector<32x16xbf16>, vector<96x16xf32> -> vector<96x16xf32>
    %42 = vector.extract_strided_slice %41 {offsets = [0, 0], sizes = [32, 16], strides = [1, 1]} : vector<96x16xf32> to vector<32x16xf32>
    %43 = vector.extract_strided_slice %41 {offsets = [32, 0], sizes = [32, 16], strides = [1, 1]} : vector<96x16xf32> to vector<32x16xf32>
    %44 = vector.extract_strided_slice %41 {offsets = [64, 0], sizes = [32, 16], strides = [1, 1]} : vector<96x16xf32> to vector<32x16xf32>
    %c1_i32 = arith.constant 1 : i32
    %45 = vector.broadcast %c1_i32 : i32 to vector<16x16xi32>
    %46 = arith.subi %37, %45 : vector<16x16xi32>
    %47 = arith.cmpi eq, %36, %46 : vector<16x16xi32>
    %48 = arith.extui %47 : vector<16x16xi1> to vector<16x16xi32>
    %49 = arith.sitofp %48 : vector<16x16xi32> to vector<16x16xf32>
    %c1_i32_25 = arith.constant 1 : i32
    %50 = vector.broadcast %c1_i32_25 : i32 to vector<16x16xi32>
    %51 = arith.addi %37, %50 : vector<16x16xi32>
    %52 = arith.cmpi eq, %36, %51 : vector<16x16xi32>
    %53 = arith.extui %52 : vector<16x16xi1> to vector<16x16xi32>
    %54 = arith.sitofp %53 : vector<16x16xi32> to vector<16x16xf32>
    %cst_26 = arith.constant dense<0.000000e+00> : vector<32x16xf32>
    %55 = tpu.matmul %42, %49, %cst_26 {dimension_numbers = #tpu.dot_dimension_numbers<[1], [0], [0], [1], [0, 0, 1, 1], [], []>} : vector<32x16xf32>, vector<16x16xf32>, vector<32x16xf32> -> vector<32x16xf32>
    %56 = arith.addf %43, %55 : vector<32x16xf32>
    %cst_27 = arith.constant dense<0.000000e+00> : vector<32x16xf32>
    %57 = tpu.matmul %44, %54, %cst_27 {dimension_numbers = #tpu.dot_dimension_numbers<[1], [0], [0], [1], [0, 0, 1, 1], [], []>} : vector<32x16xf32>, vector<16x16xf32>, vector<32x16xf32> -> vector<32x16xf32>
    %58 = arith.addf %56, %57 : vector<32x16xf32>
    %c0_28 = arith.constant 0 : index
    %c0_29 = arith.constant 0 : index
    %c0_30 = arith.constant 0 : index
    %59 = vector.load %arg9[%c0_28, %c0_29, %c0_30] : memref<5x32x1xf32, #tpu.memory_space<vmem>>, vector<1x32x1xf32>
    %60 = vector.shape_cast %59 : vector<1x32x1xf32> to vector<32x1xf32>
    %61 = vector.broadcast %60 : vector<32x1xf32> to vector<32x16xf32>
    %62 = arith.addf %58, %61 : vector<32x16xf32>
    %c0_31 = arith.constant 0 : index
    %c0_32 = arith.constant 0 : index
    %c0_33 = arith.constant 0 : index
    %63 = vector.load %arg10[%c0_31, %c0_32, %c0_33] : memref<5x32x32xbf16, #tpu.memory_space<vmem>>, vector<1x32x32xbf16>
    %64 = vector.shape_cast %63 : vector<1x32x32xbf16> to vector<32x32xbf16>
    %65 = arith.truncf %62 : vector<32x16xf32> to vector<32x16xbf16>
    %cst_34 = arith.constant dense<0.000000e+00> : vector<32x16xf32>
    %66 = tpu.matmul %64, %65, %cst_34 {dimension_numbers = #tpu.dot_dimension_numbers<[1], [0], [0], [1], [0, 0, 1, 1], [], []>} : vector<32x32xbf16>, vector<32x16xbf16>, vector<32x16xf32> -> vector<32x16xf32>
    %c0_35 = arith.constant 0 : index
    %c0_36 = arith.constant 0 : index
    %c0_37 = arith.constant 0 : index
    %67 = vector.load %arg11[%c0_35, %c0_36, %c0_37] : memref<5x32x1xf32, #tpu.memory_space<vmem>>, vector<1x32x1xf32>
    %68 = vector.shape_cast %67 : vector<1x32x1xf32> to vector<32x1xf32>
    %69 = vector.broadcast %68 : vector<32x1xf32> to vector<32x16xf32>
    %70 = arith.addf %66, %69 : vector<32x16xf32>
    %71 = arith.addf %70, %35 : vector<32x16xf32>
    %cst_38 = arith.constant 0.000000e+00 : f32
    %72 = vector.broadcast %cst_38 : f32 to vector<32x16xf32>
    %73 = arith.cmpf ogt, %71, %72 : vector<32x16xf32>
    %cst_39 = arith.constant 2.000000e-01 : f32
    %74 = vector.broadcast %cst_39 : f32 to vector<32x16xf32>
    %75 = arith.mulf %74, %71 : vector<32x16xf32>
    %76 = arith.select %73, %71, %75 : vector<32x16xi1>, vector<32x16xf32>
    %77 = arith.truncf %76 : vector<32x16xf32> to vector<32x16xbf16>
    %c1 = arith.constant 1 : index
    %c0_40 = arith.constant 0 : index
    %c0_41 = arith.constant 0 : index
    %78 = vector.load %arg8[%c1, %c0_40, %c0_41] : memref<5x96x32xbf16, #tpu.memory_space<vmem>>, vector<1x96x32xbf16>
    %79 = vector.shape_cast %78 : vector<1x96x32xbf16> to vector<96x32xbf16>
    %cst_42 = arith.constant dense<0.000000e+00> : vector<96x16xf32>
    %80 = tpu.matmul %79, %77, %cst_42 {dimension_numbers = #tpu.dot_dimension_numbers<[1], [0], [0], [1], [0, 0, 1, 1], [], []>} : vector<96x32xbf16>, vector<32x16xbf16>, vector<96x16xf32> -> vector<96x16xf32>
    %81 = vector.extract_strided_slice %80 {offsets = [0, 0], sizes = [32, 16], strides = [1, 1]} : vector<96x16xf32> to vector<32x16xf32>
    %82 = vector.extract_strided_slice %80 {offsets = [32, 0], sizes = [32, 16], strides = [1, 1]} : vector<96x16xf32> to vector<32x16xf32>
    %83 = vector.extract_strided_slice %80 {offsets = [64, 0], sizes = [32, 16], strides = [1, 1]} : vector<96x16xf32> to vector<32x16xf32>
    %c3_i32 = arith.constant 3 : i32
    %84 = vector.broadcast %c3_i32 : i32 to vector<16x16xi32>
    %85 = arith.subi %37, %84 : vector<16x16xi32>
    %86 = arith.cmpi eq, %36, %85 : vector<16x16xi32>
    %87 = arith.extui %86 : vector<16x16xi1> to vector<16x16xi32>
    %88 = arith.sitofp %87 : vector<16x16xi32> to vector<16x16xf32>
    %c3_i32_43 = arith.constant 3 : i32
    %89 = vector.broadcast %c3_i32_43 : i32 to vector<16x16xi32>
    %90 = arith.addi %37, %89 : vector<16x16xi32>
    %91 = arith.cmpi eq, %36, %90 : vector<16x16xi32>
    %92 = arith.extui %91 : vector<16x16xi1> to vector<16x16xi32>
    %93 = arith.sitofp %92 : vector<16x16xi32> to vector<16x16xf32>
    %cst_44 = arith.constant dense<0.000000e+00> : vector<32x16xf32>
    %94 = tpu.matmul %81, %88, %cst_44 {dimension_numbers = #tpu.dot_dimension_numbers<[1], [0], [0], [1], [0, 0, 1, 1], [], []>} : vector<32x16xf32>, vector<16x16xf32>, vector<32x16xf32> -> vector<32x16xf32>
    %95 = arith.addf %82, %94 : vector<32x16xf32>
    %cst_45 = arith.constant dense<0.000000e+00> : vector<32x16xf32>
    %96 = tpu.matmul %83, %93, %cst_45 {dimension_numbers = #tpu.dot_dimension_numbers<[1], [0], [0], [1], [0, 0, 1, 1], [], []>} : vector<32x16xf32>, vector<16x16xf32>, vector<32x16xf32> -> vector<32x16xf32>
    %97 = arith.addf %95, %96 : vector<32x16xf32>
    %c1_46 = arith.constant 1 : index
    %c0_47 = arith.constant 0 : index
    %c0_48 = arith.constant 0 : index
    %98 = vector.load %arg9[%c1_46, %c0_47, %c0_48] : memref<5x32x1xf32, #tpu.memory_space<vmem>>, vector<1x32x1xf32>
    %99 = vector.shape_cast %98 : vector<1x32x1xf32> to vector<32x1xf32>
    %100 = vector.broadcast %99 : vector<32x1xf32> to vector<32x16xf32>
    %101 = arith.addf %97, %100 : vector<32x16xf32>
    %c1_49 = arith.constant 1 : index
    %c0_50 = arith.constant 0 : index
    %c0_51 = arith.constant 0 : index
    %102 = vector.load %arg10[%c1_49, %c0_50, %c0_51] : memref<5x32x32xbf16, #tpu.memory_space<vmem>>, vector<1x32x32xbf16>
    %103 = vector.shape_cast %102 : vector<1x32x32xbf16> to vector<32x32xbf16>
    %104 = arith.truncf %101 : vector<32x16xf32> to vector<32x16xbf16>
    %cst_52 = arith.constant dense<0.000000e+00> : vector<32x16xf32>
    %105 = tpu.matmul %103, %104, %cst_52 {dimension_numbers = #tpu.dot_dimension_numbers<[1], [0], [0], [1], [0, 0, 1, 1], [], []>} : vector<32x32xbf16>, vector<32x16xbf16>, vector<32x16xf32> -> vector<32x16xf32>
    %c1_53 = arith.constant 1 : index
    %c0_54 = arith.constant 0 : index
    %c0_55 = arith.constant 0 : index
    %106 = vector.load %arg11[%c1_53, %c0_54, %c0_55] : memref<5x32x1xf32, #tpu.memory_space<vmem>>, vector<1x32x1xf32>
    %107 = vector.shape_cast %106 : vector<1x32x1xf32> to vector<32x1xf32>
    %108 = vector.broadcast %107 : vector<32x1xf32> to vector<32x16xf32>
    %109 = arith.addf %105, %108 : vector<32x16xf32>
    %110 = arith.addf %109, %76 : vector<32x16xf32>
    %cst_56 = arith.constant 0.000000e+00 : f32
    %111 = vector.broadcast %cst_56 : f32 to vector<32x16xf32>
    %112 = arith.cmpf ogt, %110, %111 : vector<32x16xf32>
    %cst_57 = arith.constant 2.000000e-01 : f32
    %113 = vector.broadcast %cst_57 : f32 to vector<32x16xf32>
    %114 = arith.mulf %113, %110 : vector<32x16xf32>
    %115 = arith.select %112, %110, %114 : vector<32x16xi1>, vector<32x16xf32>
    %116 = arith.truncf %115 : vector<32x16xf32> to vector<32x16xbf16>
    %c2 = arith.constant 2 : index
    %c0_58 = arith.constant 0 : index
    %c0_59 = arith.constant 0 : index
    %117 = vector.load %arg8[%c2, %c0_58, %c0_59] : memref<5x96x32xbf16, #tpu.memory_space<vmem>>, vector<1x96x32xbf16>
    %118 = vector.shape_cast %117 : vector<1x96x32xbf16> to vector<96x32xbf16>
    %cst_60 = arith.constant dense<0.000000e+00> : vector<96x16xf32>
    %119 = tpu.matmul %118, %116, %cst_60 {dimension_numbers = #tpu.dot_dimension_numbers<[1], [0], [0], [1], [0, 0, 1, 1], [], []>} : vector<96x32xbf16>, vector<32x16xbf16>, vector<96x16xf32> -> vector<96x16xf32>
    %120 = vector.extract_strided_slice %119 {offsets = [0, 0], sizes = [32, 16], strides = [1, 1]} : vector<96x16xf32> to vector<32x16xf32>
    %121 = vector.extract_strided_slice %119 {offsets = [32, 0], sizes = [32, 16], strides = [1, 1]} : vector<96x16xf32> to vector<32x16xf32>
    %122 = vector.extract_strided_slice %119 {offsets = [64, 0], sizes = [32, 16], strides = [1, 1]} : vector<96x16xf32> to vector<32x16xf32>
    %c9_i32 = arith.constant 9 : i32
    %123 = vector.broadcast %c9_i32 : i32 to vector<16x16xi32>
    %124 = arith.subi %37, %123 : vector<16x16xi32>
    %125 = arith.cmpi eq, %36, %124 : vector<16x16xi32>
    %126 = arith.extui %125 : vector<16x16xi1> to vector<16x16xi32>
    %127 = arith.sitofp %126 : vector<16x16xi32> to vector<16x16xf32>
    %c9_i32_61 = arith.constant 9 : i32
    %128 = vector.broadcast %c9_i32_61 : i32 to vector<16x16xi32>
    %129 = arith.addi %37, %128 : vector<16x16xi32>
    %130 = arith.cmpi eq, %36, %129 : vector<16x16xi32>
    %131 = arith.extui %130 : vector<16x16xi1> to vector<16x16xi32>
    %132 = arith.sitofp %131 : vector<16x16xi32> to vector<16x16xf32>
    %cst_62 = arith.constant dense<0.000000e+00> : vector<32x16xf32>
    %133 = tpu.matmul %120, %127, %cst_62 {dimension_numbers = #tpu.dot_dimension_numbers<[1], [0], [0], [1], [0, 0, 1, 1], [], []>} : vector<32x16xf32>, vector<16x16xf32>, vector<32x16xf32> -> vector<32x16xf32>
    %134 = arith.addf %121, %133 : vector<32x16xf32>
    %cst_63 = arith.constant dense<0.000000e+00> : vector<32x16xf32>
    %135 = tpu.matmul %122, %132, %cst_63 {dimension_numbers = #tpu.dot_dimension_numbers<[1], [0], [0], [1], [0, 0, 1, 1], [], []>} : vector<32x16xf32>, vector<16x16xf32>, vector<32x16xf32> -> vector<32x16xf32>
    %136 = arith.addf %134, %135 : vector<32x16xf32>
    %c2_64 = arith.constant 2 : index
    %c0_65 = arith.constant 0 : index
    %c0_66 = arith.constant 0 : index
    %137 = vector.load %arg9[%c2_64, %c0_65, %c0_66] : memref<5x32x1xf32, #tpu.memory_space<vmem>>, vector<1x32x1xf32>
    %138 = vector.shape_cast %137 : vector<1x32x1xf32> to vector<32x1xf32>
    %139 = vector.broadcast %138 : vector<32x1xf32> to vector<32x16xf32>
    %140 = arith.addf %136, %139 : vector<32x16xf32>
    %c2_67 = arith.constant 2 : index
    %c0_68 = arith.constant 0 : index
    %c0_69 = arith.constant 0 : index
    %141 = vector.load %arg10[%c2_67, %c0_68, %c0_69] : memref<5x32x32xbf16, #tpu.memory_space<vmem>>, vector<1x32x32xbf16>
    %142 = vector.shape_cast %141 : vector<1x32x32xbf16> to vector<32x32xbf16>
    %143 = arith.truncf %140 : vector<32x16xf32> to vector<32x16xbf16>
    %cst_70 = arith.constant dense<0.000000e+00> : vector<32x16xf32>
    %144 = tpu.matmul %142, %143, %cst_70 {dimension_numbers = #tpu.dot_dimension_numbers<[1], [0], [0], [1], [0, 0, 1, 1], [], []>} : vector<32x32xbf16>, vector<32x16xbf16>, vector<32x16xf32> -> vector<32x16xf32>
    %c2_71 = arith.constant 2 : index
    %c0_72 = arith.constant 0 : index
    %c0_73 = arith.constant 0 : index
    %145 = vector.load %arg11[%c2_71, %c0_72, %c0_73] : memref<5x32x1xf32, #tpu.memory_space<vmem>>, vector<1x32x1xf32>
    %146 = vector.shape_cast %145 : vector<1x32x1xf32> to vector<32x1xf32>
    %147 = vector.broadcast %146 : vector<32x1xf32> to vector<32x16xf32>
    %148 = arith.addf %144, %147 : vector<32x16xf32>
    %149 = arith.addf %148, %115 : vector<32x16xf32>
    %cst_74 = arith.constant 0.000000e+00 : f32
    %150 = vector.broadcast %cst_74 : f32 to vector<32x16xf32>
    %151 = arith.cmpf ogt, %149, %150 : vector<32x16xf32>
    %cst_75 = arith.constant 2.000000e-01 : f32
    %152 = vector.broadcast %cst_75 : f32 to vector<32x16xf32>
    %153 = arith.mulf %152, %149 : vector<32x16xf32>
    %154 = arith.select %151, %149, %153 : vector<32x16xi1>, vector<32x16xf32>
    %155 = arith.truncf %154 : vector<32x16xf32> to vector<32x16xbf16>
    %c3 = arith.constant 3 : index
    %c32 = arith.constant 32 : index
    %c0_76 = arith.constant 0 : index
    %156 = vector.load %arg8[%c3, %c32, %c0_76] : memref<5x96x32xbf16, #tpu.memory_space<vmem>>, vector<1x32x32xbf16>
    %157 = vector.shape_cast %156 : vector<1x32x32xbf16> to vector<32x32xbf16>
    %cst_77 = arith.constant dense<0.000000e+00> : vector<32x16xf32>
    %158 = tpu.matmul %157, %155, %cst_77 {dimension_numbers = #tpu.dot_dimension_numbers<[1], [0], [0], [1], [0, 0, 1, 1], [], []>} : vector<32x32xbf16>, vector<32x16xbf16>, vector<32x16xf32> -> vector<32x16xf32>
    %c3_78 = arith.constant 3 : index
    %c0_79 = arith.constant 0 : index
    %c0_80 = arith.constant 0 : index
    %159 = vector.load %arg9[%c3_78, %c0_79, %c0_80] : memref<5x32x1xf32, #tpu.memory_space<vmem>>, vector<1x32x1xf32>
    %160 = vector.shape_cast %159 : vector<1x32x1xf32> to vector<32x1xf32>
    %161 = vector.broadcast %160 : vector<32x1xf32> to vector<32x16xf32>
    %162 = arith.addf %158, %161 : vector<32x16xf32>
    %c3_81 = arith.constant 3 : index
    %c0_82 = arith.constant 0 : index
    %c0_83 = arith.constant 0 : index
    %163 = vector.load %arg10[%c3_81, %c0_82, %c0_83] : memref<5x32x32xbf16, #tpu.memory_space<vmem>>, vector<1x32x32xbf16>
    %164 = vector.shape_cast %163 : vector<1x32x32xbf16> to vector<32x32xbf16>
    %165 = arith.truncf %162 : vector<32x16xf32> to vector<32x16xbf16>
    %cst_84 = arith.constant dense<0.000000e+00> : vector<32x16xf32>
    %166 = tpu.matmul %164, %165, %cst_84 {dimension_numbers = #tpu.dot_dimension_numbers<[1], [0], [0], [1], [0, 0, 1, 1], [], []>} : vector<32x32xbf16>, vector<32x16xbf16>, vector<32x16xf32> -> vector<32x16xf32>
    %c3_85 = arith.constant 3 : index
    %c0_86 = arith.constant 0 : index
    %c0_87 = arith.constant 0 : index
    %167 = vector.load %arg11[%c3_85, %c0_86, %c0_87] : memref<5x32x1xf32, #tpu.memory_space<vmem>>, vector<1x32x1xf32>
    %168 = vector.shape_cast %167 : vector<1x32x1xf32> to vector<32x1xf32>
    %169 = vector.broadcast %168 : vector<32x1xf32> to vector<32x16xf32>
    %170 = arith.addf %166, %169 : vector<32x16xf32>
    %171 = arith.addf %170, %154 : vector<32x16xf32>
    %cst_88 = arith.constant 0.000000e+00 : f32
    %172 = vector.broadcast %cst_88 : f32 to vector<32x16xf32>
    %173 = arith.cmpf ogt, %171, %172 : vector<32x16xf32>
    %cst_89 = arith.constant 2.000000e-01 : f32
    %174 = vector.broadcast %cst_89 : f32 to vector<32x16xf32>
    %175 = arith.mulf %174, %171 : vector<32x16xf32>
    %176 = arith.select %173, %171, %175 : vector<32x16xi1>, vector<32x16xf32>
    %177 = arith.truncf %176 : vector<32x16xf32> to vector<32x16xbf16>
    %c4 = arith.constant 4 : index
    %c0_90 = arith.constant 0 : index
    %c0_91 = arith.constant 0 : index
    %178 = vector.load %arg8[%c4, %c0_90, %c0_91] : memref<5x96x32xbf16, #tpu.memory_space<vmem>>, vector<1x96x32xbf16>
    %179 = vector.shape_cast %178 : vector<1x96x32xbf16> to vector<96x32xbf16>
    %cst_92 = arith.constant dense<0.000000e+00> : vector<96x16xf32>
    %180 = tpu.matmul %179, %177, %cst_92 {dimension_numbers = #tpu.dot_dimension_numbers<[1], [0], [0], [1], [0, 0, 1, 1], [], []>} : vector<96x32xbf16>, vector<32x16xbf16>, vector<96x16xf32> -> vector<96x16xf32>
    %181 = vector.extract_strided_slice %180 {offsets = [0, 0], sizes = [32, 16], strides = [1, 1]} : vector<96x16xf32> to vector<32x16xf32>
    %182 = vector.extract_strided_slice %180 {offsets = [32, 0], sizes = [32, 16], strides = [1, 1]} : vector<96x16xf32> to vector<32x16xf32>
    %183 = vector.extract_strided_slice %180 {offsets = [64, 0], sizes = [32, 16], strides = [1, 1]} : vector<96x16xf32> to vector<32x16xf32>
    %c1_i32_93 = arith.constant 1 : i32
    %184 = vector.broadcast %c1_i32_93 : i32 to vector<16x16xi32>
    %185 = arith.subi %37, %184 : vector<16x16xi32>
    %186 = arith.cmpi eq, %36, %185 : vector<16x16xi32>
    %187 = arith.extui %186 : vector<16x16xi1> to vector<16x16xi32>
    %188 = arith.sitofp %187 : vector<16x16xi32> to vector<16x16xf32>
    %c1_i32_94 = arith.constant 1 : i32
    %189 = vector.broadcast %c1_i32_94 : i32 to vector<16x16xi32>
    %190 = arith.addi %37, %189 : vector<16x16xi32>
    %191 = arith.cmpi eq, %36, %190 : vector<16x16xi32>
    %192 = arith.extui %191 : vector<16x16xi1> to vector<16x16xi32>
    %193 = arith.sitofp %192 : vector<16x16xi32> to vector<16x16xf32>
    %cst_95 = arith.constant dense<0.000000e+00> : vector<32x16xf32>
    %194 = tpu.matmul %181, %188, %cst_95 {dimension_numbers = #tpu.dot_dimension_numbers<[1], [0], [0], [1], [0, 0, 1, 1], [], []>} : vector<32x16xf32>, vector<16x16xf32>, vector<32x16xf32> -> vector<32x16xf32>
    %195 = arith.addf %182, %194 : vector<32x16xf32>
    %cst_96 = arith.constant dense<0.000000e+00> : vector<32x16xf32>
    %196 = tpu.matmul %183, %193, %cst_96 {dimension_numbers = #tpu.dot_dimension_numbers<[1], [0], [0], [1], [0, 0, 1, 1], [], []>} : vector<32x16xf32>, vector<16x16xf32>, vector<32x16xf32> -> vector<32x16xf32>
    %197 = arith.addf %195, %196 : vector<32x16xf32>
    %c4_97 = arith.constant 4 : index
    %c0_98 = arith.constant 0 : index
    %c0_99 = arith.constant 0 : index
    %198 = vector.load %arg9[%c4_97, %c0_98, %c0_99] : memref<5x32x1xf32, #tpu.memory_space<vmem>>, vector<1x32x1xf32>
    %199 = vector.shape_cast %198 : vector<1x32x1xf32> to vector<32x1xf32>
    %200 = vector.broadcast %199 : vector<32x1xf32> to vector<32x16xf32>
    %201 = arith.addf %197, %200 : vector<32x16xf32>
    %c4_100 = arith.constant 4 : index
    %c0_101 = arith.constant 0 : index
    %c0_102 = arith.constant 0 : index
    %202 = vector.load %arg10[%c4_100, %c0_101, %c0_102] : memref<5x32x32xbf16, #tpu.memory_space<vmem>>, vector<1x32x32xbf16>
    %203 = vector.shape_cast %202 : vector<1x32x32xbf16> to vector<32x32xbf16>
    %204 = arith.truncf %201 : vector<32x16xf32> to vector<32x16xbf16>
    %cst_103 = arith.constant dense<0.000000e+00> : vector<32x16xf32>
    %205 = tpu.matmul %203, %204, %cst_103 {dimension_numbers = #tpu.dot_dimension_numbers<[1], [0], [0], [1], [0, 0, 1, 1], [], []>} : vector<32x32xbf16>, vector<32x16xbf16>, vector<32x16xf32> -> vector<32x16xf32>
    %c4_104 = arith.constant 4 : index
    %c0_105 = arith.constant 0 : index
    %c0_106 = arith.constant 0 : index
    %206 = vector.load %arg11[%c4_104, %c0_105, %c0_106] : memref<5x32x1xf32, #tpu.memory_space<vmem>>, vector<1x32x1xf32>
    %207 = vector.shape_cast %206 : vector<1x32x1xf32> to vector<32x1xf32>
    %208 = vector.broadcast %207 : vector<32x1xf32> to vector<32x16xf32>
    %209 = arith.addf %205, %208 : vector<32x16xf32>
    %210 = arith.addf %209, %176 : vector<32x16xf32>
    %cst_107 = arith.constant 0.000000e+00 : f32
    %211 = vector.broadcast %cst_107 : f32 to vector<32x16xf32>
    %212 = arith.cmpf ogt, %210, %211 : vector<32x16xf32>
    %cst_108 = arith.constant 2.000000e-01 : f32
    %213 = vector.broadcast %cst_108 : f32 to vector<32x16xf32>
    %214 = arith.mulf %213, %210 : vector<32x16xf32>
    %215 = arith.select %212, %210, %214 : vector<32x16xi1>, vector<32x16xf32>
    %216 = vector.shape_cast %215 : vector<32x16xf32> to vector<1x32x16xf32>
    %cst_109 = arith.constant dense<0.000000e+00> : vector<1xf32>
    %217 = vector.multi_reduction <add>, %216, %cst_109 [1, 2] : vector<1x32x16xf32> to vector<1xf32>
    %218 = vector.shape_cast %217 : vector<1xf32> to vector<1x1x1xf32>
    %219 = vector.extract %218[0, 0, 0] : f32 from vector<1x1x1xf32>
    %cst_110 = arith.constant 5.120000e+02 : f32
    %220 = arith.divf %219, %cst_110 : f32
    %221 = vector.broadcast %220 : f32 to vector<32x16xf32>
    %222 = arith.subf %215, %221 : vector<32x16xf32>
    %223 = arith.mulf %222, %222 : vector<32x16xf32>
    %224 = vector.shape_cast %223 : vector<32x16xf32> to vector<1x32x16xf32>
    %cst_111 = arith.constant dense<0.000000e+00> : vector<1xf32>
    %225 = vector.multi_reduction <add>, %224, %cst_111 [1, 2] : vector<1x32x16xf32> to vector<1xf32>
    %226 = vector.shape_cast %225 : vector<1xf32> to vector<1x1x1xf32>
    %227 = vector.extract %226[0, 0, 0] : f32 from vector<1x1x1xf32>
    %cst_112 = arith.constant 5.120000e+02 : f32
    %228 = arith.divf %227, %cst_112 : f32
    %cst_113 = arith.constant 9.99999993E-9 : f32
    %229 = arith.addf %228, %cst_113 : f32
    %230 = math.rsqrt %229 : f32
    %231 = vector.broadcast %230 : f32 to vector<32x16xf32>
    %232 = arith.mulf %215, %231 : vector<32x16xf32>
    %c0_114 = arith.constant 0 : index
    %c0_115 = arith.constant 0 : index
    %c0_116 = arith.constant 0 : index
    %233 = vector.load %arg12[%c0_114, %c0_115, %c0_116] : memref<1x32x16xf32, #tpu.memory_space<vmem>>, vector<1x32x16xf32>
    %234 = vector.shape_cast %233 : vector<1x32x16xf32> to vector<32x16xf32>
    %235 = vector.shape_cast %232 : vector<32x16xf32> to vector<1x32x16xf32>
    tpu.vector_store %arg12[%c0_114, %c0_115, %c0_116], %235 {strides = array<i32>} : memref<1x32x16xf32, #tpu.memory_space<vmem>>, vector<1x32x16xf32>,
    return
  }
  func.func @transform_0(%arg0: i32) -> (i32, i32, i32) {
    %c0_i32 = arith.constant 0 : i32
    %c0_i32_0 = arith.constant 0 : i32
    %c0_i32_1 = arith.constant 0 : i32
    return %arg0, %c0_i32, %c0_i32_0 : i32, i32, i32
  }
  func.func @transform_1(%arg0: i32) -> (i32, i32) {
    %c0_i32 = arith.constant 0 : i32
    %c0_i32_0 = arith.constant 0 : i32
    %c0_i32_1 = arith.constant 0 : i32
    return %c0_i32, %c0_i32_0 : i32, i32
  }
  func.func @transform_2(%arg0: i32) -> (i32, i32) {
    %c0_i32 = arith.constant 0 : i32
    %c0_i32_0 = arith.constant 0 : i32
    %c0_i32_1 = arith.constant 0 : i32
    return %c0_i32, %c0_i32_0 : i32, i32
  }
  func.func @transform_3(%arg0: i32) -> (i32, i32) {
    %c0_i32 = arith.constant 0 : i32
    %c0_i32_0 = arith.constant 0 : i32
    %c0_i32_1 = arith.constant 0 : i32
    return %c0_i32, %c0_i32_0 : i32, i32
  }
  func.func @transform_4(%arg0: i32) -> (i32, i32) {
    %c0_i32 = arith.constant 0 : i32
    %c0_i32_0 = arith.constant 0 : i32
    %c0_i32_1 = arith.constant 0 : i32
    return %c0_i32, %c0_i32_0 : i32, i32
  }
  func.func @transform_5(%arg0: i32) -> (i32, i32) {
    %c0_i32 = arith.constant 0 : i32
    %c0_i32_0 = arith.constant 0 : i32
    %c0_i32_1 = arith.constant 0 : i32
    return %c0_i32, %c0_i32_0 : i32, i32
  }
  func.func @transform_6(%arg0: i32) -> (i32, i32) {
    %c0_i32 = arith.constant 0 : i32
    %c0_i32_0 = arith.constant 0 : i32
    %c0_i32_1 = arith.constant 0 : i32
    return %c0_i32, %c0_i32_0 : i32, i32
  }
  func.func @transform_7(%arg0: i32) -> (i32, i32, i32) {
    %c0_i32 = arith.constant 0 : i32
    %c0_i32_0 = arith.constant 0 : i32
    %c0_i32_1 = arith.constant 0 : i32
    %c0_i32_2 = arith.constant 0 : i32
    return %c0_i32, %c0_i32_0, %c0_i32_1 : i32, i32, i32
  }
  func.func @transform_8(%arg0: i32) -> (i32, i32, i32) {
    %c0_i32 = arith.constant 0 : i32
    %c0_i32_0 = arith.constant 0 : i32
    %c0_i32_1 = arith.constant 0 : i32
    %c0_i32_2 = arith.constant 0 : i32
    return %c0_i32, %c0_i32_0, %c0_i32_1 : i32, i32, i32
  }
  func.func @transform_9(%arg0: i32) -> (i32, i32, i32) {
    %c0_i32 = arith.constant 0 : i32
    %c0_i32_0 = arith.constant 0 : i32
    %c0_i32_1 = arith.constant 0 : i32
    %c0_i32_2 = arith.constant 0 : i32
    return %c0_i32, %c0_i32_0, %c0_i32_1 : i32, i32, i32
  }
  func.func @transform_10(%arg0: i32) -> (i32, i32, i32) {
    %c0_i32 = arith.constant 0 : i32
    %c0_i32_0 = arith.constant 0 : i32
    %c0_i32_1 = arith.constant 0 : i32
    %c0_i32_2 = arith.constant 0 : i32
    return %c0_i32, %c0_i32_0, %c0_i32_1 : i32, i32, i32
  }
  func.func @transform_11(%arg0: i32) -> (i32, i32, i32) {
    %c0_i32 = arith.constant 0 : i32
    %c0_i32_0 = arith.constant 0 : i32
    %c0_i32_1 = arith.constant 0 : i32
    return %arg0, %c0_i32, %c0_i32_0 : i32, i32, i32
  }
}

module attributes {stable_mosaic.version = 11 : i64} {
  func.func @_head_kernel(%arg0: i32, %arg1: memref<8x32xf32, #tpu.memory_space<vmem>>, %arg2: memref<32x96xbf16, #tpu.memory_space<vmem>>, %arg3: memref<1x96xf32, #tpu.memory_space<vmem>>, %arg4: memref<32x96xbf16, #tpu.memory_space<vmem>>, %arg5: memref<1x96xf32, #tpu.memory_space<vmem>>, %arg6: memref<64x64xf32, #tpu.memory_space<vmem>>, %arg7: memref<64x256xbf16, #tpu.memory_space<vmem>>, %arg8: memref<8x128xf32, #tpu.memory_space<vmem>>, %arg9: memref<8x256xf32, #tpu.memory_space<vmem>>) attributes {dimension_semantics = [#tpu.dimension_semantics<arbitrary>], iteration_bounds = array<i64: 1>, scalar_prefetch = 0 : i64, scratch_operands = 0 : i64, tpu.core_type = #tpu.core_type<tc>, window_params = [{pipeline_mode = #tpu.pipeline_mode<synchronous>, transform_indices = @transform_0, window_bounds = array<i64: 8, 32>}, {pipeline_mode = #tpu.pipeline_mode<synchronous>, transform_indices = @transform_1, window_bounds = array<i64: 32, 96>}, {pipeline_mode = #tpu.pipeline_mode<synchronous>, transform_indices = @transform_2, window_bounds = array<i64: 1, 96>}, {pipeline_mode = #tpu.pipeline_mode<synchronous>, transform_indices = @transform_3, window_bounds = array<i64: 32, 96>}, {pipeline_mode = #tpu.pipeline_mode<synchronous>, transform_indices = @transform_4, window_bounds = array<i64: 1, 96>}, {pipeline_mode = #tpu.pipeline_mode<synchronous>, transform_indices = @transform_5, window_bounds = array<i64: 64, 64>}, {pipeline_mode = #tpu.pipeline_mode<synchronous>, transform_indices = @transform_6, window_bounds = array<i64: 64, 256>}, {pipeline_mode = #tpu.pipeline_mode<synchronous>, transform_indices = @transform_7, window_bounds = array<i64: 8, 128>}, {pipeline_mode = #tpu.pipeline_mode<synchronous>, transform_indices = @transform_8, window_bounds = array<i64: 8, 256>}]} {
    %c0 = arith.constant 0 : index
    %c0_0 = arith.constant 0 : index
    %0 = vector.load %arg1[%c0, %c0_0] : memref<8x32xf32, #tpu.memory_space<vmem>>, vector<8x32xf32>
    %1 = arith.truncf %0 : vector<8x32xf32> to vector<8x32xbf16>
    %c0_1 = arith.constant 0 : index
    %c0_2 = arith.constant 0 : index
    %2 = vector.load %arg2[%c0_1, %c0_2] : memref<32x96xbf16, #tpu.memory_space<vmem>>, vector<32x96xbf16>
    %cst = arith.constant dense<0.000000e+00> : vector<8x96xf32>
    %3 = tpu.matmul %1, %2, %cst {dimension_numbers = #tpu.dot_dimension_numbers<[1], [0], [0], [1], [0, 0, 1, 1], [], []>} : vector<8x32xbf16>, vector<32x96xbf16>, vector<8x96xf32> -> vector<8x96xf32>
    %c0_3 = arith.constant 0 : index
    %c0_4 = arith.constant 0 : index
    %4 = vector.load %arg3[%c0_3, %c0_4] : memref<1x96xf32, #tpu.memory_space<vmem>>, vector<1x96xf32>
    %5 = vector.broadcast %4 : vector<1x96xf32> to vector<8x96xf32>
    %6 = arith.addf %3, %5 : vector<8x96xf32>
    %7 = vector.extract_strided_slice %6 {offsets = [0, 32], sizes = [8, 32], strides = [1, 1]} : vector<8x96xf32> to vector<8x32xf32>
    %8 = arith.truncf %7 : vector<8x32xf32> to vector<8x32xbf16>
    %c0_5 = arith.constant 0 : index
    %c0_6 = arith.constant 0 : index
    %9 = vector.load %arg4[%c0_5, %c0_6] : memref<32x96xbf16, #tpu.memory_space<vmem>>, vector<32x96xbf16>
    %cst_7 = arith.constant dense<0.000000e+00> : vector<8x96xf32>
    %10 = tpu.matmul %8, %9, %cst_7 {dimension_numbers = #tpu.dot_dimension_numbers<[1], [0], [0], [1], [0, 0, 1, 1], [], []>} : vector<8x32xbf16>, vector<32x96xbf16>, vector<8x96xf32> -> vector<8x96xf32>
    %c0_8 = arith.constant 0 : index
    %c0_9 = arith.constant 0 : index
    %11 = vector.load %arg5[%c0_8, %c0_9] : memref<1x96xf32, #tpu.memory_space<vmem>>, vector<1x96xf32>
    %12 = vector.broadcast %11 : vector<1x96xf32> to vector<8x96xf32>
    %13 = arith.addf %10, %12 : vector<8x96xf32>
    %14 = vector.extract_strided_slice %13 {offsets = [0, 0], sizes = [8, 32], strides = [1, 1]} : vector<8x96xf32> to vector<8x32xf32>
    %15 = arith.negf %14 : vector<8x32xf32>
    %16 = math.exp %15 : vector<8x32xf32>
    %cst_10 = arith.constant 1.000000e+00 : f32
    %17 = vector.broadcast %cst_10 : f32 to vector<8x32xf32>
    %18 = arith.addf %17, %16 : vector<8x32xf32>
    %19 = arith.divf %17, %18 : vector<8x32xf32>
    %20 = vector.extract_strided_slice %13 {offsets = [0, 32], sizes = [8, 64], strides = [1, 1]} : vector<8x96xf32> to vector<8x64xf32>
    %cst_11 = arith.constant dense<0xFF800000> : vector<8xf32>
    %21 = vector.multi_reduction <maximumf>, %20, %cst_11 [1] : vector<8x64xf32> to vector<8xf32>
    %22 = vector.shape_cast %21 : vector<8xf32> to vector<8x1xf32>
    %23 = vector.broadcast %22 : vector<8x1xf32> to vector<8x64xf32>
    %24 = arith.subf %20, %23 : vector<8x64xf32>
    %25 = math.exp %24 : vector<8x64xf32>
    %c0_12 = arith.constant 0 : index
    %c0_13 = arith.constant 0 : index
    %26 = vector.load %arg6[%c0_12, %c0_13] : memref<64x64xf32, #tpu.memory_space<vmem>>, vector<64x64xf32>
    %cst_14 = arith.constant dense<0.000000e+00> : vector<8x64xf32>
    %27 = tpu.matmul %25, %26, %cst_14 {dimension_numbers = #tpu.dot_dimension_numbers<[1], [0], [0], [1], [0, 0, 1, 1], [], []>} : vector<8x64xf32>, vector<64x64xf32>, vector<8x64xf32> -> vector<8x64xf32>
    %28 = tpu.reciprocal %27 {approx = true} : vector<8x64xf32> -> vector<8x64xf32>
    %29 = arith.mulf %25, %28 : vector<8x64xf32>
    %30 = arith.truncf %29 : vector<8x64xf32> to vector<8x64xbf16>
    %c0_15 = arith.constant 0 : index
    %c0_16 = arith.constant 0 : index
    %31 = vector.load %arg7[%c0_15, %c0_16] : memref<64x256xbf16, #tpu.memory_space<vmem>>, vector<64x256xbf16>
    %cst_17 = arith.constant dense<0.000000e+00> : vector<8x256xf32>
    %32 = tpu.matmul %30, %31, %cst_17 {dimension_numbers = #tpu.dot_dimension_numbers<[1], [0], [0], [1], [0, 0, 1, 1], [], []>} : vector<8x64xbf16>, vector<64x256xbf16>, vector<8x256xf32> -> vector<8x256xf32>
    %c0_18 = arith.constant 0 : index
    %c0_19 = arith.constant 0 : index
    %33 = vector.load %arg9[%c0_18, %c0_19] : memref<8x256xf32, #tpu.memory_space<vmem>>, vector<8x256xf32>
    tpu.vector_store %arg9[%c0_18, %c0_19], %32 {strides = array<i32>} : memref<8x256xf32, #tpu.memory_space<vmem>>, vector<8x256xf32>,
    %c0_20 = arith.constant 0 : index
    %c0_21 = arith.constant 0 : index
    %34 = vector.load %arg8[%c0_20, %c0_21] : memref<8x128xf32, #tpu.memory_space<vmem>>, vector<8x96xf32>
    tpu.vector_store %arg8[%c0_20, %c0_21], %6 {strides = array<i32>} : memref<8x128xf32, #tpu.memory_space<vmem>>, vector<8x96xf32>,
    %c0_22 = arith.constant 0 : index
    %c96 = arith.constant 96 : index
    %35 = vector.load %arg8[%c0_22, %c96] : memref<8x128xf32, #tpu.memory_space<vmem>>, vector<8x32xf32>
    tpu.vector_store %arg8[%c0_22, %c96], %19 {strides = array<i32>} : memref<8x128xf32, #tpu.memory_space<vmem>>, vector<8x32xf32>,
    return
  }
  func.func @transform_0(%arg0: i32) -> (i32, i32) {
    %c0_i32 = arith.constant 0 : i32
    %c0_i32_0 = arith.constant 0 : i32
    %c0_i32_1 = arith.constant 0 : i32
    return %c0_i32, %c0_i32_0 : i32, i32
  }
  func.func @transform_1(%arg0: i32) -> (i32, i32) {
    %c0_i32 = arith.constant 0 : i32
    %c0_i32_0 = arith.constant 0 : i32
    %c0_i32_1 = arith.constant 0 : i32
    return %c0_i32, %c0_i32_0 : i32, i32
  }
  func.func @transform_2(%arg0: i32) -> (i32, i32) {
    %c0_i32 = arith.constant 0 : i32
    %c0_i32_0 = arith.constant 0 : i32
    %c0_i32_1 = arith.constant 0 : i32
    return %c0_i32, %c0_i32_0 : i32, i32
  }
  func.func @transform_3(%arg0: i32) -> (i32, i32) {
    %c0_i32 = arith.constant 0 : i32
    %c0_i32_0 = arith.constant 0 : i32
    %c0_i32_1 = arith.constant 0 : i32
    return %c0_i32, %c0_i32_0 : i32, i32
  }
  func.func @transform_4(%arg0: i32) -> (i32, i32) {
    %c0_i32 = arith.constant 0 : i32
    %c0_i32_0 = arith.constant 0 : i32
    %c0_i32_1 = arith.constant 0 : i32
    return %c0_i32, %c0_i32_0 : i32, i32
  }
  func.func @transform_5(%arg0: i32) -> (i32, i32) {
    %c0_i32 = arith.constant 0 : i32
    %c0_i32_0 = arith.constant 0 : i32
    %c0_i32_1 = arith.constant 0 : i32
    return %c0_i32, %c0_i32_0 : i32, i32
  }
  func.func @transform_6(%arg0: i32) -> (i32, i32) {
    %c0_i32 = arith.constant 0 : i32
    %c0_i32_0 = arith.constant 0 : i32
    %c0_i32_1 = arith.constant 0 : i32
    return %c0_i32, %c0_i32_0 : i32, i32
  }
  func.func @transform_7(%arg0: i32) -> (i32, i32) {
    %c0_i32 = arith.constant 0 : i32
    %c0_i32_0 = arith.constant 0 : i32
    %c0_i32_1 = arith.constant 0 : i32
    return %c0_i32, %c0_i32_0 : i32, i32
  }
  func.func @transform_8(%arg0: i32) -> (i32, i32) {
    %c0_i32 = arith.constant 0 : i32
    %c0_i32_0 = arith.constant 0 : i32
    %c0_i32_1 = arith.constant 0 : i32
    return %c0_i32, %c0_i32_0 : i32, i32
  }
}

module attributes {stable_mosaic.version = 11 : i64} {
  func.func @_event_sum_kernel(%arg0: i32, %arg1: i32, %arg2: memref<1x4x256xf32, #tpu.memory_space<vmem>>, %arg3: memref<1x1x256xf32, #tpu.memory_space<vmem>>) attributes {dimension_semantics = [#tpu.dimension_semantics<parallel>, #tpu.dimension_semantics<parallel>], iteration_bounds = array<i64: 2, 1>, scalar_prefetch = 0 : i64, scratch_operands = 0 : i64, tpu.core_type = #tpu.core_type<tc>, window_params = [{transform_indices = @transform_0, window_bounds = array<i64: 1, 4, 256>}, {transform_indices = @transform_1, window_bounds = array<i64: 1, 1, 256>}]} {
    %c0 = arith.constant 0 : index
    %c0_0 = arith.constant 0 : index
    %c0_1 = arith.constant 0 : index
    %0 = vector.load %arg2[%c0, %c0_0, %c0_1] : memref<1x4x256xf32, #tpu.memory_space<vmem>>, vector<1x4x256xf32>
    %1 = vector.shape_cast %0 : vector<1x4x256xf32> to vector<4x256xf32>
    %cst = arith.constant dense<0.000000e+00> : vector<256xf32>
    %2 = vector.multi_reduction <add>, %1, %cst [0] : vector<4x256xf32> to vector<256xf32>
    %3 = vector.shape_cast %2 : vector<256xf32> to vector<1x256xf32>
    %c0_2 = arith.constant 0 : index
    %c0_3 = arith.constant 0 : index
    %c0_4 = arith.constant 0 : index
    %4 = vector.load %arg3[%c0_2, %c0_3, %c0_4] : memref<1x1x256xf32, #tpu.memory_space<vmem>>, vector<1x1x256xf32>
    %5 = vector.shape_cast %4 : vector<1x1x256xf32> to vector<1x256xf32>
    %6 = vector.shape_cast %3 : vector<1x256xf32> to vector<1x1x256xf32>
    tpu.vector_store %arg3[%c0_2, %c0_3, %c0_4], %6 {strides = array<i32>} : memref<1x1x256xf32, #tpu.memory_space<vmem>>, vector<1x1x256xf32>,
    return
  }
  func.func @transform_0(%arg0: i32, %arg1: i32) -> (i32, i32, i32) {
    %c0_i32 = arith.constant 0 : i32
    %c0_i32_0 = arith.constant 0 : i32
    return %arg0, %c0_i32, %arg1 : i32, i32, i32
  }
  func.func @transform_1(%arg0: i32, %arg1: i32) -> (i32, i32, i32) {
    %c0_i32 = arith.constant 0 : i32
    %c0_i32_0 = arith.constant 0 : i32
    return %arg0, %c0_i32, %arg1 : i32, i32, i32
  }
}

</mosaic_0001>

<bundles_post_ra>
// kernel: summarizer_forward.6
= control target key start
LH: loop header
LB: loop body
LE: loop exit
PB: predicated region body
PF: predicated region fallthrough
CT: control target
= control target key end

     0   :  { %v496_v0 = vmov 0.0   ;;  %vm497_vm0 = vmmov 0   ;;  %vm54_vm1 = vcmask 261120   ;;  %vm369_vm2 = vcmask 785408   ;;  %s498_s17 = smov 96   ;;  %s636_s1 = inlined_call_operand.vmem [shape: bf16[32,96], index: 1, kind: input, shape index: {}]   ;;  %s637_s0 = inlined_call_operand.vmem [shape: f32[8,32], index: 0, kind: input, shape index: {}]   ;;  %s638_s3 = inlined_call_operand.vmem [shape: bf16[32,96], index: 3, kind: input, shape index: {}]   ;;  %s639_s2 = inlined_call_operand.vmem [shape: f32[1,96], index: 2, kind: input, shape index: {}]   ;;  %s640_s7 = inlined_call_operand.vmem [shape: f32[8,128], index: 7, kind: output, shape index: {0}]   ;;  %s641_s4 = inlined_call_operand.vmem [shape: f32[1,96], index: 4, kind: input, shape index: {}]   ;;  %s642_s5 = inlined_call_operand.vmem [shape: f32[64,64], index: 5, kind: input, shape index: {}]   ;;  %s643_s6 = inlined_call_operand.vmem [shape: bf16[64,256], index: 6, kind: input, shape index: {}]   ;;  %s644_s8 = inlined_call_operand.vmem [shape: f32[8,256], index: 8, kind: output, shape index: {1}]  }
   0x1   :  { %419 = vmatprep.subr.bf16.mxu0 %v496_v0  ;;  %v472_v1 = vld [vmem:[%s636_s1] sm:$0xff]   ;;  %423 = vmatprep.mubr.msk.bf16.mxu0 %vm497_vm0, %v496_v0  ;;  %v473_v2 = vld [vmem:[%s636_s1 + $0x8] sm:$0xff]   ;;  %vm174_vm3 = vcmask 785664   ;;  %v499_v22 = vmov 0.0|0.0   ;;  %v183_v25 = vld [vmem:[%s642_s5 + $0x10] sm:$0xff]  ;;  %vm192_vm4 = vcmask 523264  }
   0x2   :  { %427 = vmatprep.subr.bf16.mxu1 %v496_v0  ;;  %431 = vmatprep.mubr.msk.bf16.mxu1 %vm497_vm0, %v496_v0  ;;  %v29_v3 = vld [vmem:[%s637_s0] sm:$0xff]  ;;  %v475_v6 = vld [vmem:[%s638_s3 + $0x8] sm:$0xff]   ;;  %v184_v27 = vld [vmem:[%s642_s5 + $0x18] sm:$0xff]  ;;  %v500_v43 = vmov 0   ;;  %s501_s0 = smov 32   ;;  %vm375_vm5 = vcmask 1048320  }
   0x3   :  { %420 = vmatpush3.bf16.msra.mxu0 %v472_v1  ;;  %v30_v4 = vpack.c.bf16 %v29_v3, %v29_v3  ;;  %v474_v5 = vld [vmem:[%s638_s3] sm:$0xff]   ;;  %v182_v24 = vld [vmem:[%s642_s5 + $0x8] sm:$0xff]  ;;  %v458_v28 = vpack.c.bf16 %v184_v27, %v183_v25  ;;  %v187_v32 = vld [vmem:[%s642_s5 + $0x30] sm:$0xff] }
   0x4   :  { %421 = vmatprep.subr.bf16.mxu0 %v496_v0  ;;  %428 = vmatpush3.bf16.msra.mxu1 %v474_v5  ;;  %v385_v7 = vld [vmem:[%s639_s2] ss:$0 sm:$0xff]  ;;  %v186_v30 = vld [vmem:[%s642_s5 + $0x28] sm:$0xff]  ;;  %v188_v33 = vld [vmem:[%s642_s5 + $0x38] sm:$0xff] }
   0x5   :  { %429 = vmatprep.subr.bf16.mxu1 %v496_v0  ;;  %v389_v15 = vld [vmem:[%s641_s4] ss:$0 sm:$0xff]  ;;  %v464_v34 = vpack.c.bf16 %v188_v33, %v187_v32  ;;  %v478_v44 = vld [vmem:[%s643_s6 + $0x4] ss:$8 sps:$4 sm:$0xff]   ;;  %v481_v45 = vld [vmem:[%s643_s6 + $0x14] ss:$8 sps:$4 sm:$0xff]  }
   0x6   :  { %v181_v23 = vld [vmem:[%s642_s5] sm:$0xff]  ;;  %v479_v47 = vld [vmem:[%s643_s6 + $0x10] ss:$8 sps:$4 sm:$0xff]   ;;  %v487_v50 = vld [vmem:[%s643_s6 + $0x34] ss:$8 sps:$4 sm:$0xff]  }
   0x7   :  { %422 = vmatpush3.bf16.msra.mxu0 %v473_v2  ;;  %v455_v26 = vpack.c.bf16 %v182_v24, %v181_v23  ;;  %v185_v29 = vld [vmem:[%s642_s5 + $0x20] sm:$0xff]  ;;  %v485_v51 = vld [vmem:[%s643_s6 + $0x30] ss:$8 sps:$4 sm:$0xff]  }
   0x8   :  { %430 = vmatpush3.bf16.msra.mxu1 %v475_v6  ;;  %454 = vmatprep.subr.bf16.mxu0 %v499_v22  ;;  %v461_v31 = vpack.c.bf16 %v186_v30, %v185_v29  ;;  %v476_v42 = vld [vmem:[%s643_s6] ss:$8 sps:$4 sm:$0xff]   ;;  %v484_v48 = vld [vmem:[%s643_s6 + $0x24] ss:$8 sps:$4 sm:$0xff]  }
   0x9   :  { %326 = vmatprep.subr.bf16.mxu1 %v478_v44  ;;  %v482_v49 = vld [vmem:[%s643_s6 + $0x20] ss:$8 sps:$4 sm:$0xff]  }
   0xa   :  { %424 = vmatmul.mubr.msk.bf16.vlgmr.msra.gmra.mrb[0].mxu0 %vm54_vm1, %v30_v4 }
   0xb   :  { %451 = vmatprep.mubr.msk.f32.mxu0 %vm497_vm0, %v496_v0  ;;  %456 = vmatpush3.bf16.msra.mxu0 %v455_v26 }
   0xc   :  { %457 = vmatprep.subr.bf16.mxu0 %v499_v22 }
   0xf   :  { %459 = vmatpush3.bf16.msra.mxu0 %v458_v28 }
  0x10   :  { %460 = vmatprep.subr.bf16.mxu0 %v499_v22 }
  0x13   :  { %462 = vmatpush3.bf16.msra.mxu0 %v461_v31 }
  0x14   :  { %463 = vmatprep.subr.bf16.mxu0 %v499_v22 }
  0x17   :  { %465 = vmatpush3.bf16.msra.mxu0 %v464_v34 }
  0xdd   :  { %v92_v8 = vpop.f32.mrb[0].mxu0 }
  0xde   :  { %v93_v9 = vadd.f32 %v385_v7, %v92_v8  ;;  %v425_v10 = vpop.f32.mrb[1].mxu0 }
  0xdf   :  { %v95_v11 = vpop.f32.mrb[2].mxu0 }
  0xe0   :  { %370 = vst.msk [vmem:[%s640_s7] sm:$0xff] %vm369_vm2, %v93_v9  ;;  %v426_v12 = vpop.f32.mrb[3].mxu0  ;;  %v98_v13 = vpack.c.bf16 %v93_v9, %v93_v9 }
  0xe2   :  { %111 = vrot.lane.b32.xlu0 %v98_v13, %s498_s17 }
 0x154   :  { %v112_v14 = vpop.permute.xlu0 %111 }
 0x155   :  { %432 = vmatmul.mubr.msk.bf16.vlgmr.msra.gmra.mrb[0].mxu1 %vm54_vm1, %v112_v14 }
 0x156   :  { %358 = vmatprep.mubr.bf16.mxu1 %v500_v43  ;;  %327 = vmatpush1.bf16.msra.mxu1 %v476_v42 }
 0x157   :  { %328 = vmatprep.subr.bf16.mxu1 %v481_v45 }
 0x15a   :  { %329 = vmatpush1.bf16.msra.mxu1 %v479_v47 }
 0x15b   :  { %330 = vmatprep.subr.bf16.mxu1 %v484_v48 }
 0x15e   :  { %331 = vmatpush1.bf16.msra.mxu1 %v482_v49 }
 0x15f   :  { %332 = vmatprep.subr.bf16.mxu1 %v487_v50 }
 0x162   :  { %333 = vmatpush1.bf16.msra.mxu1 %v485_v51 }
 0x228   :  { %v162_v16 = vpop.f32.mrb[0].mxu1 }
 0x229   :  { %v163_v17 = vadd.f32 %v389_v15, %v162_v16  ;;  %v433_v18 = vpop.f32.mrb[1].mxu1 }
 0x22a   :  { %v165_v19 = vpop.f32.mrb[2].mxu1 }
 0x22b   :  { %v434_v20 = vpop.f32.mrb[3].mxu1  ;;  %v175_v21 = vsel %vm174_vm3, %v163_v17, -inf  ;;  %v393_v52 = vmul.f32 -1.442695, %v163_v17 }
 0x22c   :  { %176 = vmax.xlane.f32.xlu0 %v175_v21 }
 0x2b9   :  { %v177_v35 = vpop.xlane.xlu0 %176 }
 0x2ba   :  { %v178_v36 = vsub.f32 %v163_v17, %v177_v35 }
 0x2bc   :  { %v179_v37 = vmul.f32 1.442695, %v178_v36 }
 0x2be   :  { %488 = vpow2.f32 %v179_v37 }
 0x2c8   :  { %v489_v38 = vpop.eup %488 }
 0x2c9   :  { %190 = vrot.lane.b32.xlu1 %v489_v38, %s498_s17 }
 0x33b   :  { %v191_v39 = vpop.permute.xlu1 %190 }
 0x33c   :  { %452 = vmatmul.mubr.msk.f32.vlgmr.msra.gmra.mrb[4].mxu0 %vm192_vm4, %v191_v39 }
 0x40f   :  { %v261_v40 = vpop.f32.mrb[4].mxu0 }
 0x410   :  { %490 = vrcp.f32 %v261_v40  ;;  %v453_v41 = vpop.f32.mrb[5].mxu0 }
 0x411   :  { %492 = vpow2.f32 %v393_v52 }
 0x41a   :  { %v491_v46 = vpop.eup %490 }
 0x41b   :  { %267 = vrot.lane.b32.xlu1 %v491_v46, %s501_s0  ;;  %v493_v53 = vpop.eup %492 }
 0x41c   :  { %v171_v54 = vadd.f32 1.0, %v493_v53 }
 0x41e   :  { %494 = vrcp.f32 %v171_v54 }
 0x428   :  { %v495_v58 = vpop.eup %494 }
 0x48d   :  { %v268_v55 = vpop.permute.xlu1 %267 }
 0x48e   :  { %v270_v56 = vmul.f32 %v489_v38, %v268_v55 }
 0x490   :  { %v271_v57 = vpack.c.bf16 %v270_v56, %v270_v56 }
 0x492   :  { %281 = vrot.lane.b32.xlu1 %v271_v57, %s498_s17 }
 0x496   :  { %372 = vrot.lane.b32.xlu1 %v495_v58, %s498_s17 }
 0x504   :  { %v282_v59 = vpop.permute.xlu1 %281 }
 0x505   :  { %403 = vmatmul.mubr.msk.bf16.vlgmr.msra.gmra.mrb[4].mxu1 %vm192_vm4, %v282_v59 }
 0x508   :  { %v373_v60 = vpop.permute.xlu1 %372 }
 0x509   :  { %376 = vst.msk [vmem:[%s640_s7] sm:$0xff] %vm375_vm5, %v373_v60 }
 0x5d8   :  { %v360_v61 = vpop.f32.mrb[4].mxu1 }
 0x5d9   :  { %367 = vst [vmem:[%s644_s8] sm:$0xff] %v360_v61  ;;  %v362_v62 = vpop.f32.mrb[5].mxu1 }
 0x5da   :  { %368 = vst [vmem:[%s644_s8 + $0x8] sm:$0xff] %v362_v62  ;;  %v364_v63 = vpop.f32.mrb[6].mxu1 }
 0x5db   :  { %v365_v0 = vpop.f32.mrb[7].mxu1 }

// kernel: summarizer_forward.5
= control target key start
LH: loop header
LB: loop body
LE: loop exit
PB: predicated region body
PF: predicated region fallthrough
CT: control target
= control target key end

     0   :  { %s3829_s17 = smov 0   ;;  %s4370_s0 = inlined_call_operand.vmem [shape: f32[2,16,16], index: 0, kind: input, shape index: {}]   ;;  %s4371_s1 = inlined_call_operand.vmem [shape: bf16[33,16], index: 1, kind: input, shape index: {}]   ;;  %s4372_s2 = inlined_call_operand.vmem [shape: bf16[32,16], index: 2, kind: input, shape index: {}]   ;;  %s4373_s3 = inlined_call_operand.vmem [shape: f32[32,1], index: 3, kind: input, shape index: {}]   ;;  %s4374_s4 = inlined_call_operand.vmem [shape: bf16[32,32], index: 4, kind: input, shape index: {}]   ;;  %s4375_s5 = inlined_call_operand.vmem [shape: bf16[32,33], index: 5, kind: input, shape index: {}]   ;;  %s4376_s6 = inlined_call_operand.vmem [shape: f32[32,1], index: 6, kind: input, shape index: {}]   ;;  %s4377_s7 = inlined_call_operand.vmem [shape: bf16[5,96,32], index: 7, kind: input, shape index: {}]   ;;  %s4378_s8 = inlined_call_operand.vmem [shape: f32[5,32,1], index: 8, kind: input, shape index: {}]   ;;  %s4379_s9 = inlined_call_operand.vmem [shape: bf16[5,32,32], index: 9, kind: input, shape index: {}]   ;;  %s4380_s10 = inlined_call_operand.vmem [shape: f32[5,32,1], index: 10, kind: input, shape index: {}]   ;;  %s4381_s11 = inlined_call_operand.vmem [shape: f32[2,32,16], index: 11, kind: output, shape index: {}]  }
   0x1 LB: > { %s3061_s18 = sadd.s32 4294967295, %s3762_s17   ;;  %p3065_p0 = scmp.ge.s32.totalorder %s3762_s17, 1  ;;  %s3762_s17 = sphi %s3829_s17, %s21_s17  }
   0x2   : > { %p337_p1 = scmp.lt.s32.totalorder %s3762_s17, 3 }
   0x4   : > { %p338_p2 = pnand %p3065_p0, %p337_p1 }
   0x5   : > { %p377_p3 = scmp.lt.s32.totalorder (!%p338_p2), %s3061_s18, 1  ;;  %v3707_v0 = vld [vmem:[%s4372_s2] sm:$0xff] (!%p338_p2)   ;;  %vm429_vm0 = vcmask (!%p338_p2), 130048   ;;  %v397_v2 = vld [vmem:[%s4373_s3 + $0x10] sm:$0xff] (!%p338_p2)  ;;  %v3764_v3 = vmov (!%p338_p2), 0   ;;  %v396_v4 = vld [vmem:[%s4373_s3 + $0x8] sm:$0xff] (!%p338_p2) }
   0x6   : > { %341 = sbr.rel (%p338_p2) target bundleno = 4686 (0x124e), region = 64  ;;  %3428 = vmatprep.mubr.msk.bf16.mxu0 (!%p338_p2), %vm429_vm0, %v3707_v0  ;;  %v395_v1 = vld [vmem:[%s4373_s3] sm:$0xff] (!%p338_p2)  ;;  %3705 = vset.pattern.permute.xlu0 (!%p338_p2), %v3764_v3  ;;  %v398_v5 = vld [vmem:[%s4373_s3 + $0x18] sm:$0xff] (!%p338_p2)  ;;  %v3708_v9 = vld [vmem:[%s4372_s2 + $0x8] sm:$0xff] (!%p338_p2)   ;;  %vm592_vm1 = vcmask (!%p338_p2), 1040384   ;;  %vm585_vm2 = vcmask (!%p338_p2), 269312  }
   0x7   : > { %3706 = vset.pattern.permute.xlu1 (!%p338_p2), %v3764_v3  ;;  %401 = vperm.xlu0 (!%p338_p2), %3705, %v395_v1   ;;  %v713_v33 = vld [vmem:[%s4376_s6] sm:$0xff] (!%p338_p2)  ;;  %v715_v34 = vld [vmem:[%s4376_s6 + $0x10] sm:$0xff] (!%p338_p2)  ;;  %vm657_vm3 = vcmask (!%p338_p2), 261120  }
   0x8   : > { %411 = vperm.xlu1 (!%p338_p2), %3706, %v397_v2   ;;  %v1105_v35 = vld [vmem:[%s4378_s8] sm:$0xff] (!%p338_p2)  ;;  %v1107_v36 = vld [vmem:[%s4378_s8 + $0x10] sm:$0xff] (!%p338_p2) }
   0x9   : > { %v1139_v37 = vld [vmem:[%s4380_s10] sm:$0xff] (!%p338_p2)  ;;  %v1141_v38 = vld [vmem:[%s4380_s10 + $0x10] sm:$0xff] (!%p338_p2) }
   0xa   : > { %v3159_v39 = vld [vmem:[%s4378_s8 + $0x20] sm:$0xff] (!%p338_p2)  ;;  %v3161_v40 = vld [vmem:[%s4378_s8 + $0x30] sm:$0xff] (!%p338_p2) }
   0xb   : > { %406 = vperm.xlu0 (!%p338_p2), %3705, %v396_v4   ;;  %v3167_v41 = vld [vmem:[%s4380_s10 + $0x20] sm:$0xff] (!%p338_p2)  ;;  %v3169_v42 = vld [vmem:[%s4380_s10 + $0x30] sm:$0xff] (!%p338_p2) }
   0xc   : > { %416 = vperm.xlu1 (!%p338_p2), %3706, %v398_v5   ;;  %v3214_v43 = vld [vmem:[%s4378_s8 + $0x40] sm:$0xff] (!%p338_p2)  ;;  %v3216_v44 = vld [vmem:[%s4378_s8 + $0x50] sm:$0xff] (!%p338_p2) }
   0xd   : > { %s4387_s18 = smov (!%p377_p3, %s3061_s18), 1  ;;  %v3222_v45 = vld [vmem:[%s4380_s10 + $0x40] sm:$0xff]  ;;  %v3224_v46 = vld [vmem:[%s4380_s10 + $0x50] sm:$0xff] }
   0xe   : > { %s3308_s27 = sshll.u32 %s4387_s18, 4  ;;  %v3234_v47 = vld [vmem:[%s4378_s8 + $0x60] sm:$0xff]  ;;  %v3236_v48 = vld [vmem:[%s4378_s8 + $0x70] sm:$0xff]  ;;  %s3309_s14 = sshll.u32 %s4387_s18, 5 }
   0xf   : > { %s381_s13 = scalar_lea.vmem %s4370_s0, %s3308_s27  ;;  %v3246_v49 = vld [vmem:[%s4380_s10 + $0x60] sm:$0xff]  ;;  %v3248_v50 = vld [vmem:[%s4380_s10 + $0x70] sm:$0xff] }
  0x10   : > { %v392_v6 = vld [vmem:[%s381_s13] sm:$0xff]  ;;  %v393_v7 = vld [vmem:[%s381_s13 + $0x8] sm:$0xff]  ;;  %v3292_v52 = vld [vmem:[%s4378_s8 + $0x90] sm:$0xff] }
  0x11   : > { %v394_v8 = vpack.c.bf16 %v393_v7, %v392_v6  ;;  %v3290_v51 = vld [vmem:[%s4378_s8 + $0x80] sm:$0xff]  ;;  %v3300_v54 = vld [vmem:[%s4380_s10 + $0x90] sm:$0xff] }
  0x12   : > { %v3298_v53 = vld [vmem:[%s4380_s10 + $0x80] sm:$0xff] }
  0x13   : > { %3426 = vmatprep.subr.bf16.mxu0 %v394_v8 }
  0x14   : > { %3427 = vmatpush3.bf16.msra.mxu0 %v394_v8 }
  0x17   : > { %3429 = vmatmul.mubr.msk.bf16.vlgmr.msra.gmra.mrb[0].mxu0 %vm429_vm0, %v3708_v9 }
  0x86   : > { %v402_v11 = vpop.permute.xlu0 %401 }
  0x87   : > { %v412_v10 = vpop.permute.xlu1 %411 }
  0x8a   : > { %v407_v18 = vpop.permute.xlu0 %406 }
  0x8b   : > { %v417_v14 = vpop.permute.xlu1 %416 }
  0xea   : > { %v3430_v12 = vpop.f32.mrb[0].mxu0 }
  0xeb   : > { %v470_v13 = vpop.f32.mrb[1].mxu0  ;;  %v479_v15 = vadd.f32 %v3430_v12, %v412_v10 }
  0xec   : > { %v471_v16 = vadd.f32 %v470_v13, %v402_v11  ;;  %v3431_v17 = vpop.f32.mrb[2].mxu0 }
  0xed   : > { %v473_v19 = vpop.f32.mrb[3].mxu0  ;;  %v482_v21 = vadd.f32 %v3431_v17, %v417_v14  ;;  %v3867_v23 = vand.u32 2147483647, %v479_v15  ;;  %v714_v15 = vld [vmem:[%s4376_s6 + $0x8] sm:$0xff] }
  0xee   : > { %v3865_v20 = vand.u32 2147483647, %v471_v16  ;;  %v474_v22 = vadd.f32 %v473_v19, %v407_v18  ;;  %v716_v16 = vld [vmem:[%s4376_s6 + $0x18] sm:$0xff]  ;;  %v1106_v17 = vld [vmem:[%s4378_s8 + $0x8] sm:$0xff] }
  0xef   : > { %v3873_v26 = vand.u32 2147483647, %v482_v21  ;;  %v492_v29 = vsel %vm429_vm0, %v3867_v23, 0.0  ;;  %v1108_v18 = vld [vmem:[%s4378_s8 + $0x18] sm:$0xff]  ;;  %v1140_v19 = vld [vmem:[%s4380_s10 + $0x8] sm:$0xff] }
  0xf0   : > { %v3869_v24 = vand.u32 2147483647, %v474_v22  ;;  %v489_v25 = vsel %vm429_vm0, %v3865_v20, 0.0  ;;  %v1142_v21 = vld [vmem:[%s4380_s10 + $0x18] sm:$0xff]  ;;  %v3160_v22 = vld [vmem:[%s4378_s8 + $0x28] sm:$0xff] }
  0xf1   : > { %v494_v31 = vsel %vm429_vm0, %v3873_v26, 0.0 }
  0xf2   : > { %v490_v27 = vsel %vm429_vm0, %v3869_v24, 0.0 }
  0xf3   : > { %v491_v28 = vadd.f32 %v490_v27, %v489_v25  ;;  %v3162_v25 = vld [vmem:[%s4378_s8 + $0x38] sm:$0xff]  ;;  %v3168_v27 = vld [vmem:[%s4380_s10 + $0x28] sm:$0xff] }
  0xf5   : > { %v493_v30 = vadd.f32 %v492_v29, %v491_v28  ;;  %v3170_v28 = vld [vmem:[%s4380_s10 + $0x38] sm:$0xff]  ;;  %v3215_v29 = vld [vmem:[%s4378_s8 + $0x48] sm:$0xff] }
  0xf7   : > { %v495_v32 = vadd.f32 %v494_v31, %v493_v30  ;;  %v3217_v30 = vld [vmem:[%s4378_s8 + $0x58] sm:$0xff]  ;;  %v3223_v31 = vld [vmem:[%s4380_s10 + $0x48] sm:$0xff] }
  0xf9   : > { %496 = vadd.xlane.f32.xlu0 %v495_v32  ;;  %v3225_v32 = vld [vmem:[%s4380_s10 + $0x58] sm:$0xff] }
 0x10f   : > { %719 = vperm.xlu0 %3705, %v713_v33   ;;  %v3235_v33 = vld [vmem:[%s4378_s8 + $0x68] sm:$0xff] }
 0x113   : > { %729 = vperm.xlu0 %3705, %v715_v34   ;;  %v3237_v34 = vld [vmem:[%s4378_s8 + $0x78] sm:$0xff] }
 0x117   : > { %1111 = vperm.xlu0 %3705, %v1105_v35   ;;  %v3247_v35 = vld [vmem:[%s4380_s10 + $0x68] sm:$0xff] }
 0x11b   : > { %1121 = vperm.xlu0 %3705, %v1107_v36   ;;  %v3249_v36 = vld [vmem:[%s4380_s10 + $0x78] sm:$0xff] }
 0x11f   : > { %1145 = vperm.xlu0 %3705, %v1139_v37   ;;  %v3291_v37 = vld [vmem:[%s4378_s8 + $0x88] sm:$0xff] }
 0x123   : > { %1155 = vperm.xlu0 %3705, %v1141_v38   ;;  %v3293_v38 = vld [vmem:[%s4378_s8 + $0x98] sm:$0xff] }
 0x127   : > { %1611 = vperm.xlu0 %3705, %v3159_v39   ;;  %v3299_v39 = vld [vmem:[%s4380_s10 + $0x88] sm:$0xff] }
 0x12b   : > { %1621 = vperm.xlu0 %3705, %v3161_v40   ;;  %v3301_v40 = vld [vmem:[%s4380_s10 + $0x98] sm:$0xff] }
 0x12f   : > { %1647 = vperm.xlu0 %3705, %v3167_v41   ;;  %v3709_v41 = vld [vmem:[%s4371_s1] sm:$0xff]  }
 0x130   : > { %3432 = vmatprep.subr.bf16.mxu1 %v3709_v41 }
 0x131   : > { %3433 = vmatpush3.bf16.msra.mxu1 %v3709_v41 }
 0x133   : > { %1657 = vperm.xlu0 %3705, %v3169_v42   ;;  %v3710_v42 = vld [vmem:[%s4371_s1 + $0x8] sm:$0xff]  }
 0x134   : > { %3434 = vmatprep.subr.bf16.mxu1 %v3710_v42 }
 0x135   : > { %3435 = vmatpush3.bf16.msra.mxu1 %v3710_v42 }
 0x137   : > { %2113 = vperm.xlu0 %3705, %v3214_v43   ;;  %v3711_v43 = vld [vmem:[%s4371_s1 + $0x10] ss:$0 sps:$4 sm:$0x11]  }
 0x13b   : > { %2123 = vperm.xlu0 %3705, %v3216_v44   ;;  %v594_v44 = vsel %vm592_vm1, 65535, %v3764_v3 }
 0x13f   : > { %2149 = vperm.xlu0 %3705, %v3222_v45   ;;  %v596_v45 = vand.u32 %v3711_v43, %v594_v44  ;;  %v3722_v43 = vld [vmem:[%s4379_s9] sm:$0xff]  }
 0x141   : > { %3436 = vmatprep.subr.bf16.mxu1 %v596_v45 }
 0x142   : > { %3437 = vmatpush3.bf16.msra.mxu1 %v596_v45 }
 0x143   : > { %2159 = vperm.xlu0 %3705, %v3224_v46   ;;  %v3712_v46 = vld [vmem:[%s4375_s5] sm:$0xff]  }
 0x144   : > { %3438 = vmatprep.mubr.msk.bf16.mxu1 %vm585_vm2, %v3712_v46 }
 0x147   : > { %2262 = vperm.xlu0 %3705, %v3234_v47  }
 0x14b   : > { %2272 = vperm.xlu0 %3705, %v3236_v48   ;;  %v3713_v48 = vld [vmem:[%s4375_s5 + $0x8] sm:$0xff]  }
 0x14c   : > { %3439 = vmatmul.mubr.msk.bf16.vlgmr.msra.gmra.mrb[0].mxu1 %vm585_vm2, %v3713_v48 }
 0x14f   : > { %2359 = vperm.xlu0 %3705, %v3246_v49  }
 0x153   : > { %2369 = vperm.xlu0 %3705, %v3248_v50  }
 0x157   : > { %2811 = vperm.xlu0 %3705, %v3290_v51  }
 0x15b   : > { %2821 = vperm.xlu0 %3705, %v3292_v52  }
 0x15f   : > { %2847 = vperm.xlu0 %3705, %v3298_v53  }
 0x163   : > { %2857 = vperm.xlu0 %3705, %v3300_v54   ;;  %v3714_v54 = vld [vmem:[%s4374_s4] sm:$0xff]  }
 0x164   : > { %3446 = vmatprep.mubr.msk.bf16.mxu1 %vm657_vm3, %v3714_v54 }
 0x186   : > { %v497_v55 = vpop.xlane.xlu0 %496 }
 0x187   : > { %v498_v56 = vrot.slane %v497_v55, 4 }
 0x189   : > { %v499_v57 = vadd.f32 %v498_v56, %v497_v55 }
 0x18b   : > { %v500_v58 = vrot.slane %v499_v57, 2 }
 0x18d   : > { %v501_v59 = vadd.f32 %v500_v58, %v499_v57 }
 0x18f   : > { %v502_v60 = vrot.slane %v501_v59, 1 }
 0x191   : > { %v503_v61 = vadd.f32 %v502_v60, %v501_v59 }
 0x193   : > { %3680 = vpush %v503_v61 }
 0x1c4   : > { %s3681_s28 = spop %3680 }
 0x1c5   : > { %s507_s29 = smul.f32 0.001953125, %s3681_s28 }
 0x1c7   : > { %v508_v62 = vstv %s507_s29 }
 0x1c8   : > { %v509_v63 = vsub.f32 %v3865_v20, %v508_v62  ;;  %v510_v0 = vsub.f32 %v3869_v24, %v508_v62  ;;  %v511_v1 = vsub.f32 %v3867_v23, %v508_v62  ;;  %v512_v2 = vsub.f32 %v3873_v26, %v508_v62 }
 0x1ca   : > { %v513_v4 = vmul.f32 %v509_v63, %v509_v63  ;;  %v514_v5 = vmul.f32 %v510_v0, %v510_v0  ;;  %v515_v6 = vmul.f32 %v511_v1, %v511_v1  ;;  %v516_v7 = vmul.f32 %v512_v2, %v512_v2  ;;  %v3715_v0 = vld [vmem:[%s4374_s4 + $0x8] sm:$0xff]  }
 0x1cc   : > { %v517_v8 = vsel %vm429_vm0, %v513_v4, 0.0  ;;  %v518_v9 = vsel %vm429_vm0, %v514_v5, 0.0  ;;  %v520_v11 = vsel %vm429_vm0, %v515_v6, 0.0  ;;  %v522_v13 = vsel %vm429_vm0, %v516_v7, 0.0 }
 0x1cd   : > { %v519_v10 = vadd.f32 %v518_v9, %v517_v8 }
 0x1cf   : > { %v521_v12 = vadd.f32 %v520_v11, %v519_v10 }
 0x1d1   : > { %v523_v14 = vadd.f32 %v522_v13, %v521_v12  ;;  %v3717_v13 = vld [vmem:[%s4377_s7 + $0x8] sm:$0xff]  }
 0x1d3   : > { %524 = vadd.xlane.f32.xlu1 %v523_v14  ;;  %v3718_v14 = vld [vmem:[%s4377_s7 + $0x10] sm:$0xff]  }
 0x1e4   : > { %724 = vperm.xlu1 %3706, %v714_v15   ;;  %v3719_v15 = vld [vmem:[%s4377_s7 + $0x18] sm:$0xff]  }
 0x1e8   : > { %734 = vperm.xlu1 %3706, %v716_v16   ;;  %v3720_v16 = vld [vmem:[%s4377_s7 + $0x20] sm:$0xff]  }
 0x1ec   : > { %1116 = vperm.xlu1 %3706, %v1106_v17   ;;  %v3721_v17 = vld [vmem:[%s4377_s7 + $0x28] sm:$0xff]  }
 0x1f0   : > { %1126 = vperm.xlu1 %3706, %v1108_v18   ;;  %v741_v18 = vlaneseq }
 0x1f4   : > { %1150 = vperm.xlu1 %3706, %v1140_v19   ;;  %v4085_v19 = vshrl.u32 %v741_v18, 7 }
 0x1f8   : > { %1160 = vperm.xlu1 %3706, %v1142_v21   ;;  %v4087_v21 = vand.u32 127, %v741_v18 }
 0x1fc   : > { %1616 = vperm.xlu1 %3706, %v3160_v22   ;;  %v4090_v22 = vadd.s32 8, %v4085_v19 }
 0x200   : > { %1626 = vperm.xlu1 %3706, %v3162_v25   ;;  %v3097_v25 = vadd.s32 4294967295, %v4087_v21 }
 0x202   : > { %vm890_vm4 = vcmp.eq.s32.totalorder %v4085_v19, %v3097_v25  ;;  %vm891_vm5 = vcmp.eq.s32.totalorder %v4090_v22, %v3097_v25 }
 0x203   : > { %vm4095_vm6 = vmpackc.low %vm891_vm5, %vm890_vm4 }
 0x204   : > { %1652 = vperm.xlu1 %3706, %v3168_v27  }
 0x208   : > { %1662 = vperm.xlu1 %3706, %v3170_v28   ;;  %v3765_v28 = vmov 1.0|1.0  }
 0x20c   : > { %2118 = vperm.xlu1 %3706, %v3215_v29   ;;  %v896_v29 = vadd.s32 1, %v4087_v21 }
 0x20e   : > { %vm897_vm7 = vcmp.eq.s32.totalorder %v4085_v19, %v896_v29  ;;  %vm898_vm8 = vcmp.eq.s32.totalorder %v4090_v22, %v896_v29 }
 0x20f   : > { %vm4108_vm9 = vmpackc.low %vm898_vm8, %vm897_vm7 }
 0x210   : > { %2128 = vperm.xlu1 %3706, %v3217_v30  }
 0x214   : > { %2154 = vperm.xlu1 %3706, %v3223_v31  }
 0x218   : > { %2164 = vperm.xlu1 %3706, %v3225_v32  }
 0x21c   : > { %2267 = vperm.xlu1 %3706, %v3235_v33  }
 0x220   : > { %2277 = vperm.xlu1 %3706, %v3237_v34  }
 0x224   : > { %2364 = vperm.xlu1 %3706, %v3247_v35  }
 0x228   : > { %2374 = vperm.xlu1 %3706, %v3249_v36  }
 0x22c   : > { %2816 = vperm.xlu1 %3706, %v3291_v37  }
 0x230   : > { %2826 = vperm.xlu1 %3706, %v3293_v38  }
 0x234   : > { %2852 = vperm.xlu1 %3706, %v3299_v39  }
 0x238   : > { %2862 = vperm.xlu1 %3706, %v3301_v40  }
 0x260   : > { %v525_v47 = vpop.xlane.xlu1 %524 }
 0x261   : > { %v526_v49 = vrot.slane %v525_v47, 4 }
 0x263   : > { %v527_v3 = vadd.f32 %v526_v49, %v525_v47 }
 0x265   : > { %v528_v50 = vrot.slane %v527_v3, 2 }
 0x267   : > { %v529_v51 = vadd.f32 %v528_v50, %v527_v3 }
 0x269   : > { %v530_v52 = vrot.slane %v529_v51, 1 }
 0x26b   : > { %v531_v53 = vadd.f32 %v530_v52, %v529_v51 }
 0x26d   : > { %3682 = vpush %v531_v53 }
 0x29e   : > { %s3683_s16 = spop %3682 }
 0x29f   : > { %s535_s19 = smul.f32 0.001953125, %s3683_s16 }
 0x2a1   : > { %s536_s20 = sadd.f32 1e-08, %s535_s19 }
 0x2a3   : > { %v537_v55 = vstv %s536_s20  ;;  %s386_s20 = scalar_lea.vmem %s4381_s11, %s3309_s14 }
 0x2a4   : > { %3752 = vrsqrt.f32 %v537_v55 }
 0x2ae   : > { %v3753_v56 = vpop.eup %3752 }
 0x2af   : > { %3684 = vpush %v3753_v56 }
 0x2e0   : > { %s3685_s21 = spop %3684 }
 0x2e1   : > { %v540_v57 = vstv %s3685_s21 }
 0x2e2   : > { %v541_v58 = vmul.f32 %v540_v57, %v3865_v20  ;;  %v542_v59 = vmul.f32 %v540_v57, %v3869_v24  ;;  %v543_v60 = vmul.f32 %v540_v57, %v3867_v23  ;;  %v544_v61 = vmul.f32 %v540_v57, %v3873_v26  ;;  %v3716_v20 = vld [vmem:[%s4377_s7] sm:$0xff]   ;;  %v725_v23 = vpop.permute.xlu1 %724  ;;  %v720_v24 = vpop.permute.xlu0 %719 }
 0x2e3   : > { %3454 = vmatprep.mubr.msk.bf16.mxu0 %vm657_vm3, %v3716_v20 }
 0x2e4   : > { %v549_v62 = vpack.c.bf16 %v542_v59, %v541_v58  ;;  %v550_v63 = vpack.c.bf16 %v544_v61, %v543_v60 }
 0x2e6   : > { %3442 = vmatprep.subr.bf16.mxu1 %v549_v62  ;;  %v735_v4 = vpop.permute.xlu1 %734  ;;  %v730_v9 = vpop.permute.xlu0 %729 }
 0x2e7   : > { %3443 = vmatpush3.bf16.msra.mxu1 %v549_v62 }
 0x2e8   : > { %3444 = vmatprep.subr.bf16.mxu1 %v550_v63 }
 0x2ea   : > { %v1117_v51 = vpop.permute.xlu1 %1116  ;;  %v1112_v53 = vpop.permute.xlu0 %1111 }
 0x2eb   : > { %3445 = vmatpush3.bf16.msra.mxu1 %v550_v63 }
 0x2ec   : > { %3643 = vmatprep.subr.msk.bf16.mxu1 %vm4095_vm6, %v3765_v28 }
 0x2ee   : > { %3447 = vmatmul.mubr.msk.bf16.vlgmr.msra.gmra.mrb[0].mxu1 %vm657_vm3, %v3715_v0  ;;  %v1127_v62 = vpop.permute.xlu1 %1126  ;;  %v1122_v20 = vpop.permute.xlu0 %1121 }
 0x2ef   : > { %3645 = vmatpush3.bf16.msk.msra.mxu1 %vm4095_vm6, %v3765_v28 }
 0x3c1   : > { %v3448_v26 = vpop.f32.mrb[0].mxu1 }
 0x3c2   : > { %v698_v1 = vpop.f32.mrb[1].mxu1  ;;  %v4059_v10 = vadd.f32 %v3448_v26, %v730_v9 }
 0x3c3   : > { %v3449_v2 = vpop.f32.mrb[2].mxu1  ;;  %v4053_v6 = vadd.f32 %v720_v24, %v698_v1  ;;  %v3723_v1 = vld [vmem:[%s4379_s9 + $0x8] sm:$0xff]  }
 0x3c4   : > { %v701_v5 = vpop.f32.mrb[3].mxu1  ;;  %v4055_v7 = vadd.f32 %v3449_v2, %v735_v4  ;;  %v3724_v2 = vld [vmem:[%s4377_s7 + $0x30] sm:$0xff]   ;;  %v1146_v4 = vpop.permute.xlu0 %1145 }
 0x3c5   : > { %v4057_v8 = vadd.f32 %v725_v23, %v701_v5  ;;  %v1151_v5 = vpop.permute.xlu1 %1150 }
 0x3c6   : > { %v747_v12 = vpack.c.bf16 %v4055_v7, %v4059_v10 }
 0x3c7   : > { %v746_v11 = vpack.c.bf16 %v4057_v8, %v4053_v6 }
 0x3c8   : > { %v1156_v9 = vpop.permute.xlu0 %1155 }
 0x3c9   : > { %3450 = vmatprep.subr.bf16.mxu0 %v746_v11 }
 0x3ca   : > { %3451 = vmatpush3.bf16.msra.mxu0 %v746_v11 }
 0x3cb   : > { %3452 = vmatprep.subr.bf16.mxu0 %v747_v12 }
 0x3ce   : > { %3453 = vmatpush3.bf16.msra.mxu0 %v747_v12 }
 0x3cf   : > { %3647 = vmatprep.subr.msk.bf16.mxu0 %vm4108_vm9, %v3765_v28 }
 0x3d1   : > { %3455 = vmatmul.mubr.msk.bf16.vlgmr.msra.gmra.mrb[4].mxu0 %vm657_vm3, %v3717_v13 }
 0x3d2   : > { %3458 = vmatprep.mubr.msk.bf16.mxu0 %vm657_vm3, %v3718_v14  ;;  %3649 = vmatpush3.bf16.msk.msra.mxu0 %vm4108_vm9, %v3765_v28  ;;  %v1161_v14 = vpop.permute.xlu1 %1160 }
 0x3d9   : > { %3459 = vmatmul.mubr.msk.bf16.gmra.mrb[8].mxu0 %vm657_vm3, %v3719_v15 }
 0x3da   : > { %3462 = vmatprep.mubr.msk.bf16.mxu0 %vm657_vm3, %v3720_v16 }
 0x3e1   : > { %3463 = vmatmul.mubr.msk.bf16.gmra.mrb[12].mxu0 %vm657_vm3, %v3721_v17 }
 0x4a4   : > { %v3456_v31 = vpop.f32.mrb[4].mxu0 }
 0x4a5   : > { %v842_v32 = vpop.f32.mrb[5].mxu0 }
 0x4a6   : > { %v3457_v33 = vpop.f32.mrb[6].mxu0  ;;  %3470 = vmatprep.mubr.msk.f32.mxu1 %vm429_vm0, %v842_v32 }
 0x4a7   : > { %v845_v34 = vpop.f32.mrb[7].mxu0 }
 0x4a8   : > { %3471 = vmatmul.mubr.msk.f32.vlgmr.msra.gmra.mrb[4].mxu1 %vm429_vm0, %v845_v34 }
 0x4a9   : > { %3473 = vmatprep.mubr.msk.f32.mxu1 %vm429_vm0, %v3456_v31 }
 0x4ac   : > { %v3460_v35 = vpop.f32.mrb[8].mxu0  ;;  %3474 = vmatmul.mubr.msk.f32.gmra.mrb[6].mxu1 %vm429_vm0, %v3457_v33 }
 0x4ad   : > { %v858_v36 = vpop.f32.mrb[9].mxu0  ;;  %3490 = vmatprep.mubr.msk.bf16.mxu1 %vm657_vm3, %v3722_v43  ;;  %v3728_v43 = vld [vmem:[%s4377_s7 + $0x50] sm:$0xff]  }
 0x4ae   : > { %v3461_v37 = vpop.f32.mrb[10].mxu0 }
 0x4af   : > { %v861_v38 = vpop.f32.mrb[11].mxu0 }
 0x4b4   : > { %v3464_v39 = vpop.f32.mrb[12].mxu0 }
 0x4b5   : > { %v874_v40 = vpop.f32.mrb[13].mxu0 }
 0x4b6   : > { %v3465_v41 = vpop.f32.mrb[14].mxu0  ;;  %3480 = vmatprep.mubr.msk.f32.mxu0 %vm429_vm0, %v874_v40  ;;  %v3725_v40 = vld [vmem:[%s4377_s7 + $0x38] sm:$0xff]  }
 0x4b7   : > { %v877_v42 = vpop.f32.mrb[15].mxu0 }
 0x4b8   : > { %3481 = vmatmul.mubr.msk.f32.vlgmr.msra.gmra.mrb[16].mxu0 %vm429_vm0, %v877_v42  ;;  %v3727_v42 = vld [vmem:[%s4377_s7 + $0x48] sm:$0xff]  }
 0x4b9   : > { %3483 = vmatprep.mubr.msk.f32.mxu0 %vm429_vm0, %v3464_v39 }
 0x4bc   : > { %3484 = vmatmul.mubr.msk.f32.gmra.mrb[18].mxu0 %vm429_vm0, %v3465_v41  ;;  %v3726_v41 = vld [vmem:[%s4377_s7 + $0x40] sm:$0xff]  }
 0x4bd   : > { %3498 = vmatprep.mubr.msk.bf16.mxu0 %vm657_vm3, %v3724_v2 }
 0x57b   : > { %v3472_v44 = vpop.f32.mrb[4].mxu1 }
 0x57c   : > { %v1001_v45 = vadd.f32 %v3472_v44, %v861_v38  ;;  %v981_v46 = vpop.f32.mrb[5].mxu1  ;;  %v3729_v44 = vld [vmem:[%s4377_s7 + $0x58] sm:$0xff]  }
 0x57d   : > { %v1000_v47 = vadd.f32 %v981_v46, %v858_v36  ;;  %v1395_v46 = vadd.s32 3, %v4087_v21 }
 0x57f   : > { %v3475_v48 = vpop.f32.mrb[6].mxu1  ;;  %vm1396_vm2 = vcmp.eq.s32.totalorder %v4085_v19, %v1395_v46  ;;  %vm1397_vm4 = vcmp.eq.s32.totalorder %v4090_v22, %v1395_v46 }
 0x580   : > { %v1003_v49 = vadd.f32 %v3475_v48, %v3461_v37  ;;  %v991_v3 = vpop.f32.mrb[7].mxu1  ;;  %vm3654_vm5 = vmpackc.low %vm1397_vm4, %vm1396_vm2 }
 0x581   : > { %v1002_v50 = vadd.f32 %v3460_v35, %v991_v3 }
 0x58b   : > { %v3482_v52 = vpop.f32.mrb[16].mxu0 }
 0x58c   : > { %v1102_v54 = vadd.f32 %v3482_v52, %v1001_v45  ;;  %v1082_v55 = vpop.f32.mrb[17].mxu0  ;;  %v3142_v45 = vadd.s32 4294967293, %v4087_v21 }
 0x58d   : > { %v1101_v56 = vadd.f32 %v1082_v55, %v1000_v47 }
 0x58e   : > { %v1130_v57 = vadd.f32 %v1117_v51, %v1102_v54  ;;  %vm1389_vm14 = vcmp.eq.s32.totalorder %v4085_v19, %v3142_v45  ;;  %vm1390_vm15 = vcmp.eq.s32.totalorder %v4090_v22, %v3142_v45 }
 0x58f   : > { %v1129_v58 = vadd.f32 %v1112_v53, %v1101_v56  ;;  %v3485_v59 = vpop.f32.mrb[18].mxu0  ;;  %vm3650_vm1 = vmpackc.low %vm1390_vm15, %vm1389_vm14 }
 0x590   : > { %v1104_v60 = vadd.f32 %v3485_v59, %v1003_v49  ;;  %v1092_v61 = vpop.f32.mrb[19].mxu0 }
 0x591   : > { %v1103_v63 = vadd.f32 %v1092_v61, %v1002_v50  ;;  %v1137_v0 = vpack.c.bf16 %v1130_v57, %v1129_v58  ;;  %v3730_v58 = vld [vmem:[%s4379_s9 + $0x10] sm:$0xff]  }
 0x592   : > { %v1132_v23 = vadd.f32 %v1127_v62, %v1104_v60 }
 0x593   : > { %v1131_v24 = vadd.f32 %v1122_v20, %v1103_v63  ;;  %3486 = vmatprep.subr.bf16.mxu1 %v1137_v0 }
 0x594   : > { %3487 = vmatpush3.bf16.msra.mxu1 %v1137_v0 }
 0x595   : > { %v1138_v26 = vpack.c.bf16 %v1132_v23, %v1131_v24  ;;  %v1617_v24 = vpop.permute.xlu1 %1616 }
 0x597   : > { %3488 = vmatprep.subr.bf16.mxu1 %v1138_v26 }
 0x598   : > { %3489 = vmatpush3.bf16.msra.mxu1 %v1138_v26 }
 0x599   : > { %3651 = vmatprep.subr.msk.bf16.mxu1 %vm3650_vm1, %v3765_v28 }
 0x59b   : > { %3491 = vmatmul.mubr.msk.bf16.vlgmr.msra.gmra.mrb[8].mxu1 %vm657_vm3, %v3723_v1  ;;  %v1612_v1 = vpop.permute.xlu0 %1611 }
 0x59c   : > { %3653 = vmatpush3.bf16.msk.msra.mxu1 %vm3650_vm1, %v3765_v28  ;;  %vm3768_vm1 = vmmov 1  }
 0x59d   : > { %3655 = vmatprep.subr.msk.bf16.mxu1 %vm3654_vm5, %v3765_v28 }
 0x66e   : > { %v3492_v11 = vpop.f32.mrb[8].mxu1 }
 0x66f   : > { %v1222_v12 = vadd.f32 %v3492_v11, %v1156_v9  ;;  %v1213_v13 = vpop.f32.mrb[9].mxu1 }
 0x670   : > { %v1214_v15 = vadd.f32 %v1213_v13, %v1146_v4  ;;  %v3493_v16 = vpop.f32.mrb[10].mxu1 }
 0x671   : > { %v1225_v17 = vadd.f32 %v3493_v16, %v1161_v14  ;;  %v1216_v18 = vpop.f32.mrb[11].mxu1  ;;  %v1230_v25 = vadd.f32 %v1222_v12, %v4059_v10 }
 0x672   : > { %v1228_v29 = vadd.f32 %v1214_v15, %v4053_v6  ;;  %v1217_v31 = vadd.f32 %v1216_v18, %v1151_v5  ;;  %v1627_v15 = vpop.permute.xlu1 %1626  ;;  %v1622_v18 = vpop.permute.xlu0 %1621 }
 0x673   : > { %v1231_v32 = vadd.f32 %v1225_v17, %v4055_v7  ;;  %v1238_v36 = vmul.f32 0.2, %v1230_v25  ;;  %vm1234_vm13 = vcmp.gt.f32.partialorder %v1230_v25, 0.0 }
 0x674   : > { %v1236_v33 = vmul.f32 0.2, %v1228_v29  ;;  %v1229_v34 = vadd.f32 %v1217_v31, %v4057_v8  ;;  %vm1232_vm10 = vcmp.gt.f32.partialorder %v1228_v29, 0.0 }
 0x675   : > { %vm1235_vm11 = vcmp.gt.f32.partialorder %v1231_v32, 0.0  ;;  %v1239_v35 = vmul.f32 0.2, %v1231_v32  ;;  %v4150_v7 = vsel %vm1234_vm13, %v1230_v25, %v1238_v36 }
 0x676   : > { %vm1233_vm12 = vcmp.gt.f32.partialorder %v1229_v34, 0.0  ;;  %v1237_v37 = vmul.f32 0.2, %v1229_v34  ;;  %v4142_v38 = vsel %vm1232_vm10, %v1228_v29, %v1236_v33  ;;  %v3732_v33 = vld [vmem:[%s4377_s7 + $0x60] sm:$0xff]  }
 0x677   : > { %v4146_v10 = vsel %vm1235_vm11, %v1231_v32, %v1239_v35  ;;  %v3731_v32 = vld [vmem:[%s4379_s9 + $0x18] sm:$0xff]   ;;  %v1653_v35 = vpop.permute.xlu1 %1652 }
 0x678   : > { %v4144_v39 = vsel %vm1233_vm12, %v1229_v34, %v1237_v37  ;;  %v1245_v8 = vpack.c.bf16 %v4146_v10, %v4150_v7  ;;  %v1648_v34 = vpop.permute.xlu0 %1647 }
 0x679   : > { %v1244_v6 = vpack.c.bf16 %v4144_v39, %v4142_v38 }
 0x67b   : > { %3494 = vmatprep.subr.bf16.mxu0 %v1244_v6 }
 0x67c   : > { %3495 = vmatpush3.bf16.msra.mxu0 %v1244_v6  ;;  %v1658_v36 = vpop.permute.xlu0 %1657 }
 0x67d   : > { %3496 = vmatprep.subr.bf16.mxu0 %v1245_v8 }
 0x680   : > { %3497 = vmatpush3.bf16.msra.mxu0 %v1245_v8 }
 0x683   : > { %3499 = vmatmul.mubr.msk.bf16.vlgmr.msra.gmra.mrb[20].mxu0 %vm657_vm3, %v3725_v40  ;;  %v1663_v40 = vpop.permute.xlu1 %1662 }
 0x684   : > { %3502 = vmatprep.mubr.msk.bf16.mxu0 %vm657_vm3, %v3726_v41 }
 0x68b   : > { %3503 = vmatmul.mubr.msk.bf16.gmra.mrb[24].mxu0 %vm657_vm3, %v3727_v42 }
 0x68c   : > { %3506 = vmatprep.mubr.msk.bf16.mxu0 %vm657_vm3, %v3728_v43 }
 0x693   : > { %3507 = vmatmul.mubr.msk.bf16.gmra.mrb[28].mxu0 %vm657_vm3, %v3729_v44 }
 0x694   : > { %3542 = vmatprep.mubr.msk.bf16.mxu0 %vm657_vm3, %v3732_v33 }
 0x756   : > { %v3500_v47 = vpop.f32.mrb[20].mxu0 }
 0x757   : > { %v1341_v48 = vpop.f32.mrb[21].mxu0 }
 0x758   : > { %v3501_v49 = vpop.f32.mrb[22].mxu0  ;;  %3514 = vmatprep.mubr.msk.f32.mxu1 %vm429_vm0, %v1341_v48 }
 0x759   : > { %v1344_v3 = vpop.f32.mrb[23].mxu0 }
 0x75a   : > { %3515 = vmatmul.mubr.msk.f32.vlgmr.msra.gmra.mrb[12].mxu1 %vm429_vm0, %v1344_v3 }
 0x75b   : > { %3517 = vmatprep.mubr.msk.f32.mxu1 %vm429_vm0, %v3500_v47  ;;  %3657 = vmatpush3.bf16.msk.msra.mxu1 %vm3654_vm5, %v3765_v28 }
 0x75e   : > { %v3504_v50 = vpop.f32.mrb[24].mxu0  ;;  %3518 = vmatmul.mubr.msk.f32.gmra.mrb[14].mxu1 %vm429_vm0, %v3501_v49 }
 0x75f   : > { %v1357_v51 = vpop.f32.mrb[25].mxu0 }
 0x760   : > { %v3505_v52 = vpop.f32.mrb[26].mxu0 }
 0x761   : > { %v1360_v53 = vpop.f32.mrb[27].mxu0 }
 0x766   : > { %v3508_v54 = vpop.f32.mrb[28].mxu0 }
 0x767   : > { %v1373_v55 = vpop.f32.mrb[29].mxu0 }
 0x768   : > { %v3509_v56 = vpop.f32.mrb[30].mxu0  ;;  %3524 = vmatprep.mubr.msk.f32.mxu1 %vm429_vm0, %v1373_v55  ;;  %v3733_v55 = vld [vmem:[%s4377_s7 + $0x68] sm:$0xff]  }
 0x769   : > { %v1376_v57 = vpop.f32.mrb[31].mxu0 }
 0x76a   : > { %3525 = vmatmul.mubr.msk.f32.vlgmr.msra.gmra.mrb[16].mxu1 %vm429_vm0, %v1376_v57  ;;  %v3735_v57 = vld [vmem:[%s4377_s7 + $0x78] sm:$0xff]  }
 0x76b   : > { %3527 = vmatprep.mubr.msk.f32.mxu1 %vm429_vm0, %v3508_v54 }
 0x76e   : > { %3528 = vmatmul.mubr.msk.f32.gmra.mrb[18].mxu1 %vm429_vm0, %v3509_v56  ;;  %v3734_v56 = vld [vmem:[%s4377_s7 + $0x70] sm:$0xff]  }
 0x76f   : > { %3534 = vmatprep.mubr.msk.bf16.mxu1 %vm657_vm3, %v3730_v58  ;;  %v3736_v58 = vld [vmem:[%s4377_s7 + $0x80] sm:$0xff]  }
 0x82d   : > { %v3516_v59 = vpop.f32.mrb[12].mxu1 }
 0x82e   : > { %v1500_v60 = vadd.f32 %v3516_v59, %v1360_v53  ;;  %v1480_v61 = vpop.f32.mrb[13].mxu1  ;;  %v3737_v59 = vld [vmem:[%s4377_s7 + $0x88] sm:$0xff]  }
 0x82f   : > { %v1499_v62 = vadd.f32 %v1480_v61, %v1357_v51  ;;  %v1897_v61 = vadd.s32 9, %v4087_v21 }
 0x831   : > { %v3519_v63 = vpop.f32.mrb[14].mxu1  ;;  %vm1899_vm15 = vcmp.eq.s32.totalorder %v4090_v22, %v1897_v61 }
 0x832   : > { %v1502_v0 = vadd.f32 %v3519_v63, %v3505_v52  ;;  %v1490_v20 = vpop.f32.mrb[15].mxu1  ;;  %v3767_v63 = vmov 0.0   ;;  %vm3663_vm2 = vmpackc.low %vm1899_vm15, %vm3768_vm1 }
 0x833   : > { %v1501_v23 = vadd.f32 %v3504_v50, %v1490_v20 }
 0x83d   : > { %v3526_v26 = vpop.f32.mrb[16].mxu1 }
 0x83e   : > { %v1601_v2 = vadd.f32 %v3526_v26, %v1500_v60  ;;  %v1581_v4 = vpop.f32.mrb[17].mxu1  ;;  %v3199_v60 = vadd.s32 4294967287, %v4087_v21 }
 0x83f   : > { %v1600_v5 = vadd.f32 %v1581_v4, %v1499_v62  ;;  %v3766_v62 = vmov 1.0  }
 0x840   : > { %v1630_v9 = vadd.f32 %v1617_v24, %v1601_v2  ;;  %vm1891_vm12 = vcmp.eq.s32.totalorder %v4085_v19, %v3199_v60  ;;  %vm1892_vm13 = vcmp.eq.s32.totalorder %v4090_v22, %v3199_v60 }
 0x841   : > { %v1629_v11 = vadd.f32 %v1612_v1, %v1600_v5  ;;  %v3529_v12 = vpop.f32.mrb[18].mxu1  ;;  %vm3658_vm14 = vmpackc.low %vm1892_vm13, %vm1891_vm12 }
 0x842   : > { %v1603_v13 = vadd.f32 %v3529_v12, %v1502_v0  ;;  %v1591_v14 = vpop.f32.mrb[19].mxu1  ;;  %v3662_v0 = vpack.c.bf16 %v3766_v62, %v3767_v63 }
 0x843   : > { %v1602_v16 = vadd.f32 %v1591_v14, %v1501_v23  ;;  %v1638_v17 = vpack.c.bf16 %v1630_v9, %v1629_v11  ;;  %v3738_v11 = vld [vmem:[%s4379_s9 + $0x20] sm:$0xff]  }
 0x844   : > { %v1632_v25 = vadd.f32 %v1627_v15, %v1603_v13 }
 0x845   : > { %v1631_v29 = vadd.f32 %v1622_v18, %v1602_v16  ;;  %3530 = vmatprep.subr.bf16.mxu1 %v1638_v17 }
 0x846   : > { %3531 = vmatpush3.bf16.msra.mxu1 %v1638_v17 }
 0x847   : > { %v1639_v31 = vpack.c.bf16 %v1632_v25, %v1631_v29  ;;  %v2119_v29 = vpop.permute.xlu1 %2118 }
 0x849   : > { %3532 = vmatprep.subr.bf16.mxu1 %v1639_v31 }
 0x84a   : > { %3533 = vmatpush3.bf16.msra.mxu1 %v1639_v31 }
 0x84b   : > { %3659 = vmatprep.subr.msk.bf16.mxu1 %vm3658_vm14, %v3765_v28 }
 0x84d   : > { %3535 = vmatmul.mubr.msk.bf16.vlgmr.msra.gmra.mrb[20].mxu1 %vm657_vm3, %v3731_v32  ;;  %v2114_v32 = vpop.permute.xlu0 %2113 }
 0x84e   : > { %3661 = vmatpush3.bf16.msk.msra.mxu1 %vm3658_vm14, %v3765_v28 }
 0x84f   : > { %3664 = vmatprep.subr.msk.bf16.mxu1 %vm3663_vm2, %v3662_v0 }
 0x920   : > { %v3536_v37 = vpop.f32.mrb[20].mxu1 }
 0x921   : > { %v1724_v6 = vadd.f32 %v3536_v37, %v1658_v36  ;;  %v1715_v8 = vpop.f32.mrb[21].mxu1 }
 0x922   : > { %v1716_v41 = vadd.f32 %v1715_v8, %v1648_v34  ;;  %v3537_v42 = vpop.f32.mrb[22].mxu1 }
 0x923   : > { %v1727_v43 = vadd.f32 %v3537_v42, %v1663_v40  ;;  %v1718_v44 = vpop.f32.mrb[23].mxu1  ;;  %v1732_v45 = vadd.f32 %v1724_v6, %v4150_v7 }
 0x924   : > { %v1730_v46 = vadd.f32 %v1716_v41, %v4142_v38  ;;  %v1719_v47 = vadd.f32 %v1718_v44, %v1653_v35  ;;  %v2129_v41 = vpop.permute.xlu1 %2128  ;;  %v2124_v44 = vpop.permute.xlu0 %2123 }
 0x925   : > { %v1733_v48 = vadd.f32 %v1727_v43, %v4146_v10  ;;  %v1740_v51 = vmul.f32 0.2, %v1732_v45  ;;  %vm1736_vm11 = vcmp.gt.f32.partialorder %v1732_v45, 0.0 }
 0x926   : > { %v1738_v49 = vmul.f32 0.2, %v1730_v46  ;;  %v1731_v3 = vadd.f32 %v1719_v47, %v4144_v39  ;;  %vm1734_vm7 = vcmp.gt.f32.partialorder %v1730_v46, 0.0 }
 0x927   : > { %vm1737_vm8 = vcmp.gt.f32.partialorder %v1733_v48, 0.0  ;;  %v1741_v50 = vmul.f32 0.2, %v1733_v48  ;;  %v4216_v10 = vsel %vm1736_vm11, %v1732_v45, %v1740_v51 }
 0x928   : > { %vm1735_vm10 = vcmp.gt.f32.partialorder %v1731_v3, 0.0  ;;  %v1739_v52 = vmul.f32 0.2, %v1731_v3  ;;  %v4208_v53 = vsel %vm1734_vm7, %v1730_v46, %v1738_v49  ;;  %v3740_v49 = vld [vmem:[%s4377_s7 + $0xa0] sm:$0xff]  }
 0x929   : > { %v4212_v7 = vsel %vm1737_vm8, %v1733_v48, %v1741_v50  ;;  %v3739_v48 = vld [vmem:[%s4379_s9 + $0x28] sm:$0xff]   ;;  %v2155_v50 = vpop.permute.xlu1 %2154 }
 0x92a   : > { %v4210_v54 = vsel %vm1735_vm10, %v1731_v3, %v1739_v52  ;;  %v1747_v39 = vpack.c.bf16 %v4212_v7, %v4216_v10  ;;  %v2150_v3 = vpop.permute.xlu0 %2149 }
 0x92b   : > { %v1746_v38 = vpack.c.bf16 %v4210_v54, %v4208_v53 }
 0x92d   : > { %3538 = vmatprep.subr.bf16.mxu0 %v1746_v38 }
 0x92e   : > { %3539 = vmatpush3.bf16.msra.mxu0 %v1746_v38  ;;  %v2160_v51 = vpop.permute.xlu0 %2159 }
 0x92f   : > { %3540 = vmatprep.subr.bf16.mxu0 %v1747_v39 }
 0x932   : > { %3541 = vmatpush3.bf16.msra.mxu0 %v1747_v39 }
 0x935   : > { %3543 = vmatmul.mubr.msk.bf16.vlgmr.msra.gmra.mrb[32].mxu0 %vm657_vm3, %v3733_v55  ;;  %v2165_v55 = vpop.permute.xlu1 %2164 }
 0x936   : > { %3546 = vmatprep.mubr.msk.bf16.mxu0 %vm657_vm3, %v3734_v56 }
 0x93d   : > { %3547 = vmatmul.mubr.msk.bf16.gmra.mrb[36].mxu0 %vm657_vm3, %v3735_v57 }
 0x93e   : > { %3550 = vmatprep.mubr.msk.bf16.mxu0 %vm657_vm3, %v3736_v58 }
 0x945   : > { %3551 = vmatmul.mubr.msk.bf16.gmra.mrb[40].mxu0 %vm657_vm3, %v3737_v59 }
 0x946   : > { %3586 = vmatprep.mubr.msk.bf16.mxu0 %vm657_vm3, %v3740_v49 }
 0xa08   : > { %v3544_v20 = vpop.f32.mrb[32].mxu0 }
 0xa09   : > { %v1843_v23 = vpop.f32.mrb[33].mxu0 }
 0xa0a   : > { %v3545_v19 = vpop.f32.mrb[34].mxu0  ;;  %3558 = vmatprep.mubr.msk.f32.mxu1 %vm429_vm0, %v1843_v23 }
 0xa0b   : > { %v1846_v24 = vpop.f32.mrb[35].mxu0 }
 0xa0c   : > { %3559 = vmatmul.mubr.msk.f32.vlgmr.msra.gmra.mrb[24].mxu1 %vm429_vm0, %v1846_v24 }
 0xa0d   : > { %3561 = vmatprep.mubr.msk.f32.mxu1 %vm429_vm0, %v3544_v20  ;;  %3667 = vmatpush3.bf16.msk.msra.mxu1 %vm3663_vm2, %v3662_v0 }
 0xa10   : > { %v3548_v21 = vpop.f32.mrb[36].mxu0  ;;  %3562 = vmatmul.mubr.msk.f32.gmra.mrb[26].mxu1 %vm429_vm0, %v3545_v19 }
 0xa11   : > { %v1859_v22 = vpop.f32.mrb[37].mxu0 }
 0xa12   : > { %v3549_v26 = vpop.f32.mrb[38].mxu0 }
 0xa13   : > { %v1862_v1 = vpop.f32.mrb[39].mxu0 }
 0xa18   : > { %v3552_v2 = vpop.f32.mrb[40].mxu0 }
 0xa19   : > { %v1875_v4 = vpop.f32.mrb[41].mxu0 }
 0xa1a   : > { %v3553_v5 = vpop.f32.mrb[42].mxu0  ;;  %3568 = vmatprep.mubr.msk.f32.mxu1 %vm429_vm0, %v1875_v4  ;;  %v2268_v4 = vpop.permute.xlu1 %2267 }
 0xa1b   : > { %v1878_v9 = vpop.f32.mrb[43].mxu0 }
 0xa1c   : > { %3569 = vmatmul.mubr.msk.f32.vlgmr.msra.gmra.mrb[28].mxu1 %vm429_vm0, %v1878_v9 }
 0xa1d   : > { %3571 = vmatprep.mubr.msk.f32.mxu1 %vm429_vm0, %v3552_v2  ;;  %v2263_v2 = vpop.permute.xlu0 %2262 }
 0xa20   : > { %3572 = vmatmul.mubr.msk.f32.gmra.mrb[30].mxu1 %vm429_vm0, %v3553_v5 }
 0xa21   : > { %3578 = vmatprep.mubr.msk.bf16.mxu1 %vm657_vm3, %v3738_v11  ;;  %v2273_v9 = vpop.permute.xlu0 %2272 }
 0xadf   : > { %v3560_v12 = vpop.f32.mrb[24].mxu1 }
 0xae0   : > { %v2002_v13 = vadd.f32 %v3560_v12, %v1862_v1  ;;  %v1982_v14 = vpop.f32.mrb[25].mxu1  ;;  %v2278_v12 = vpop.permute.xlu1 %2277 }
 0xae1   : > { %v2001_v15 = vadd.f32 %v1982_v14, %v1859_v22 }
 0xae3   : > { %v3563_v16 = vpop.f32.mrb[26].mxu1 }
 0xae4   : > { %v2004_v17 = vadd.f32 %v3563_v16, %v3549_v26  ;;  %v1992_v18 = vpop.f32.mrb[27].mxu1 }
 0xae5   : > { %v2003_v25 = vadd.f32 %v3548_v21, %v1992_v18 }
 0xaef   : > { %v3570_v31 = vpop.f32.mrb[28].mxu1 }
 0xaf0   : > { %v2103_v33 = vadd.f32 %v3570_v31, %v2002_v13  ;;  %v2083_v34 = vpop.f32.mrb[29].mxu1  ;;  %v3743_v31 = vld [vmem:[%s4379_s9 + $0x38] sm:$0xff]  }
 0xaf1   : > { %v2102_v35 = vadd.f32 %v2083_v34, %v2001_v15  ;;  %v2365_v34 = vpop.permute.xlu1 %2364 }
 0xaf2   : > { %v2132_v36 = vadd.f32 %v2119_v29, %v2103_v33  ;;  %v2360_v33 = vpop.permute.xlu0 %2359 }
 0xaf3   : > { %v2131_v37 = vadd.f32 %v2114_v32, %v2102_v35  ;;  %v3573_v6 = vpop.f32.mrb[30].mxu1  ;;  %v3744_v32 = vld [vmem:[%s4377_s7 + $0xc0] sm:$0xff]  }
 0xaf4   : > { %v2105_v8 = vadd.f32 %v3573_v6, %v2004_v17  ;;  %v2093_v40 = vpop.f32.mrb[31].mxu1 }
 0xaf5   : > { %v2104_v42 = vadd.f32 %v2093_v40, %v2003_v25  ;;  %v2140_v43 = vpack.c.bf16 %v2132_v36, %v2131_v37 }
 0xaf6   : > { %v2134_v45 = vadd.f32 %v2129_v41, %v2105_v8  ;;  %v2370_v35 = vpop.permute.xlu0 %2369  ;;  %v2375_v8 = vpop.permute.xlu1 %2374 }
 0xaf7   : > { %v2133_v46 = vadd.f32 %v2124_v44, %v2104_v42  ;;  %3574 = vmatprep.subr.bf16.mxu1 %v2140_v43 }
 0xaf8   : > { %3575 = vmatpush3.bf16.msra.mxu1 %v2140_v43 }
 0xaf9   : > { %v2141_v47 = vpack.c.bf16 %v2134_v45, %v2133_v46 }
 0xafb   : > { %3576 = vmatprep.subr.bf16.mxu1 %v2141_v47 }
 0xafc   : > { %3577 = vmatpush3.bf16.msra.mxu1 %v2141_v47 }
 0xaff   : > { %3579 = vmatmul.mubr.msk.bf16.vlgmr.msra.gmra.mrb[32].mxu1 %vm657_vm3, %v3739_v48 }
 0xbd2   : > { %v3580_v52 = vpop.f32.mrb[32].mxu1 }
 0xbd3   : > { %v2226_v38 = vadd.f32 %v3580_v52, %v2160_v51  ;;  %v2217_v39 = vpop.f32.mrb[33].mxu1 }
 0xbd4   : > { %v2218_v56 = vadd.f32 %v2217_v39, %v2150_v3  ;;  %v3581_v57 = vpop.f32.mrb[34].mxu1 }
 0xbd5   : > { %v2229_v58 = vadd.f32 %v3581_v57, %v2165_v55  ;;  %v2220_v59 = vpop.f32.mrb[35].mxu1  ;;  %v2234_v60 = vadd.f32 %v2226_v38, %v4216_v10  ;;  %v3745_v57 = vld [vmem:[%s4377_s7 + $0xc8] sm:$0xff]  }
 0xbd6   : > { %v2232_v61 = vadd.f32 %v2218_v56, %v4208_v53  ;;  %v2221_v62 = vadd.f32 %v2220_v59, %v2155_v50  ;;  %v3747_v59 = vld [vmem:[%s4377_s7 + $0xd8] sm:$0xff]  }
 0xbd7   : > { %v2235_v63 = vadd.f32 %v2229_v58, %v4212_v7  ;;  %v2242_v19 = vmul.f32 0.2, %v2234_v60  ;;  %vm2238_vm8 = vcmp.gt.f32.partialorder %v2234_v60, 0.0  ;;  %v3742_v7 = vld [vmem:[%s4379_s9 + $0x30] sm:$0xff]  }
 0xbd8   : > { %v2240_v0 = vmul.f32 0.2, %v2232_v61  ;;  %v2233_v20 = vadd.f32 %v2221_v62, %v4210_v54  ;;  %vm2236_vm4 = vcmp.gt.f32.partialorder %v2232_v61, 0.0  ;;  %v3741_v54 = vld [vmem:[%s4377_s7 + $0xa8] sm:$0xff]   ;;  %3594 = vmatprep.mubr.msk.bf16.mxu1 %vm657_vm3, %v3742_v7  ;;  %v3746_v58 = vld [vmem:[%s4377_s7 + $0xd0] sm:$0xff]  }
 0xbd9   : > { %vm2239_vm5 = vcmp.gt.f32.partialorder %v2235_v63, 0.0  ;;  %v2243_v23 = vmul.f32 0.2, %v2235_v63  ;;  %v2246_v10 = vsel %vm2238_vm8, %v2234_v60, %v2242_v19  ;;  %v3748_v60 = vld [vmem:[%s4377_s7 + $0xe0] sm:$0xff]  }
 0xbda   : > { %vm2237_vm7 = vcmp.gt.f32.partialorder %v2233_v20, 0.0  ;;  %v2241_v24 = vmul.f32 0.2, %v2233_v20  ;;  %v2244_v21 = vsel %vm2236_vm4, %v2232_v61, %v2240_v0  ;;  %v3749_v61 = vld [vmem:[%s4377_s7 + $0xe8] sm:$0xff]  }
 0xbdb   : > { %v2247_v26 = vsel %vm2239_vm5, %v2235_v63, %v2243_v23 }
 0xbdc   : > { %v2245_v22 = vsel %vm2237_vm7, %v2233_v20, %v2241_v24  ;;  %v2249_v53 = vpack.c.bf16 %v2247_v26, %v2246_v10 }
 0xbdd   : > { %v2248_v1 = vpack.c.bf16 %v2245_v22, %v2244_v21 }
 0xbdf   : > { %3582 = vmatprep.subr.bf16.mxu0 %v2248_v1 }
 0xbe0   : > { %3583 = vmatpush3.bf16.msra.mxu0 %v2248_v1 }
 0xbe1   : > { %3584 = vmatprep.subr.bf16.mxu0 %v2249_v53 }
 0xbe4   : > { %3585 = vmatpush3.bf16.msra.mxu0 %v2249_v53 }
 0xbe7   : > { %3587 = vmatmul.mubr.msk.bf16.vlgmr.msra.gmra.mrb[44].mxu0 %vm657_vm3, %v3741_v54 }
 0xbe8   : > { %3602 = vmatprep.mubr.msk.bf16.mxu0 %vm657_vm3, %v3744_v32 }
 0xcba   : > { %v3588_v5 = vpop.f32.mrb[44].mxu0 }
 0xcbb   : > { %v2330_v11 = vpop.f32.mrb[45].mxu0  ;;  %v2339_v14 = vadd.f32 %v3588_v5, %v2273_v9 }
 0xcbc   : > { %v3589_v13 = vpop.f32.mrb[46].mxu0  ;;  %v2331_v17 = vadd.f32 %v2330_v11, %v2263_v2  ;;  %v2817_v11 = vpop.permute.xlu1 %2816 }
 0xcbd   : > { %v2342_v15 = vadd.f32 %v3589_v13, %v2278_v12  ;;  %v2333_v16 = vpop.f32.mrb[47].mxu0  ;;  %v2812_v13 = vpop.permute.xlu0 %2811 }
 0xcbe   : > { %v2334_v18 = vadd.f32 %v2333_v16, %v2268_v4 }
 0xcbf   : > { %v2351_v25 = vpack.c.bf16 %v2342_v15, %v2339_v14 }
 0xcc0   : > { %v2350_v29 = vpack.c.bf16 %v2334_v18, %v2331_v17  ;;  %v2827_v32 = vpop.permute.xlu1 %2826 }
 0xcc2   : > { %3590 = vmatprep.subr.bf16.mxu1 %v2350_v29 }
 0xcc3   : > { %3591 = vmatpush3.bf16.msra.mxu1 %v2350_v29 }
 0xcc4   : > { %3592 = vmatprep.subr.bf16.mxu1 %v2351_v25 }
 0xcc7   : > { %3593 = vmatpush3.bf16.msra.mxu1 %v2351_v25 }
 0xcc8   : > { %3669 = vmatprep.subr.msk.bf16.mxu1 %vm4095_vm6, %v3765_v28 }
 0xcca   : > { %3595 = vmatmul.mubr.msk.bf16.vlgmr.msra.gmra.mrb[36].mxu1 %vm657_vm3, %v3743_v31 }
 0xccb   : > { %3671 = vmatpush3.bf16.msk.msra.mxu1 %vm4095_vm6, %v3765_v28 }
 0xccc   : > { %3673 = vmatprep.subr.msk.bf16.mxu1 %vm4108_vm9, %v3765_v28 }
 0xd9d   : > { %v3596_v36 = vpop.f32.mrb[36].mxu1 }
 0xd9e   : > { %v2436_v37 = vadd.f32 %v3596_v36, %v2370_v35  ;;  %v2427_v6 = vpop.f32.mrb[37].mxu1  ;;  %v2822_v35 = vpop.permute.xlu0 %2821 }
 0xd9f   : > { %v2428_v40 = vadd.f32 %v2427_v6, %v2360_v33  ;;  %v3597_v27 = vpop.f32.mrb[38].mxu1 }
 0xda0   : > { %v2439_v41 = vadd.f32 %v3597_v27, %v2375_v8  ;;  %v2430_v42 = vpop.f32.mrb[39].mxu1  ;;  %v2444_v43 = vadd.f32 %v2436_v37, %v2246_v10  ;;  %v3751_v8 = vld [vmem:[%s4379_s9 + $0x48] sm:$0xff]   ;;  %v2853_v27 = vpop.permute.xlu1 %2852 }
 0xda1   : > { %v2442_v44 = vadd.f32 %v2428_v40, %v2244_v21  ;;  %v2431_v45 = vadd.f32 %v2430_v42, %v2365_v34 }
 0xda2   : > { %v2445_v46 = vadd.f32 %v2439_v41, %v2247_v26  ;;  %v2452_v3 = vmul.f32 0.2, %v2444_v43  ;;  %vm2448_vm12 = vcmp.gt.f32.partialorder %v2444_v43, 0.0  ;;  %v2848_v40 = vpop.permute.xlu0 %2847 }
 0xda3   : > { %v2450_v47 = vmul.f32 0.2, %v2442_v44  ;;  %v2443_v48 = vadd.f32 %v2431_v45, %v2245_v22  ;;  %vm2446_vm6 = vcmp.gt.f32.partialorder %v2442_v44, 0.0 }
 0xda4   : > { %vm2449_vm10 = vcmp.gt.f32.partialorder %v2445_v46, 0.0  ;;  %v2453_v49 = vmul.f32 0.2, %v2445_v46  ;;  %v4304_v55 = vsel %vm2448_vm12, %v2444_v43, %v2452_v3  ;;  %v2863_v45 = vpop.permute.xlu1 %2862 }
 0xda5   : > { %vm2447_vm11 = vcmp.gt.f32.partialorder %v2443_v48, 0.0  ;;  %v2451_v50 = vmul.f32 0.2, %v2443_v48  ;;  %v4296_v51 = vsel %vm2446_vm6, %v2442_v44, %v2450_v47 }
 0xda6   : > { %v4300_v38 = vsel %vm2449_vm10, %v2445_v46, %v2453_v49  ;;  %v2858_v41 = vpop.permute.xlu0 %2857 }
 0xda7   : > { %v4298_v52 = vsel %vm2447_vm11, %v2443_v48, %v2451_v50  ;;  %v2459_v56 = vpack.c.bf16 %v4300_v38, %v4304_v55 }
 0xda8   : > { %v2458_v39 = vpack.c.bf16 %v4298_v52, %v4296_v51 }
 0xdaa   : > { %3598 = vmatprep.subr.bf16.mxu0 %v2458_v39 }
 0xdab   : > { %3599 = vmatpush3.bf16.msra.mxu0 %v2458_v39 }
 0xdac   : > { %3600 = vmatprep.subr.bf16.mxu0 %v2459_v56 }
 0xdaf   : > { %3601 = vmatpush3.bf16.msra.mxu0 %v2459_v56 }
 0xdb2   : > { %3603 = vmatmul.mubr.msk.bf16.vlgmr.msra.gmra.mrb[48].mxu0 %vm657_vm3, %v3745_v57 }
 0xdb3   : > { %3606 = vmatprep.mubr.msk.bf16.mxu0 %vm657_vm3, %v3746_v58 }
 0xdba   : > { %3607 = vmatmul.mubr.msk.bf16.gmra.mrb[52].mxu0 %vm657_vm3, %v3747_v59 }
 0xdbb   : > { %3610 = vmatprep.mubr.msk.bf16.mxu0 %vm657_vm3, %v3748_v60 }
 0xdc2   : > { %3611 = vmatmul.mubr.msk.bf16.gmra.mrb[56].mxu0 %vm657_vm3, %v3749_v61 }
 0xe85   : > { %v3604_v62 = vpop.f32.mrb[48].mxu0 }
 0xe86   : > { %v2555_v63 = vpop.f32.mrb[49].mxu0 }
 0xe87   : > { %v3605_v0 = vpop.f32.mrb[50].mxu0  ;;  %3618 = vmatprep.mubr.msk.f32.mxu1 %vm429_vm0, %v2555_v63 }
 0xe88   : > { %v2558_v20 = vpop.f32.mrb[51].mxu0 }
 0xe89   : > { %3619 = vmatmul.mubr.msk.f32.vlgmr.msra.gmra.mrb[40].mxu1 %vm429_vm0, %v2558_v20 }
 0xe8a   : > { %3621 = vmatprep.mubr.msk.f32.mxu1 %vm429_vm0, %v3604_v62  ;;  %3675 = vmatpush3.bf16.msk.msra.mxu1 %vm4108_vm9, %v3765_v28  ;;  %v3750_v28 = vld [vmem:[%s4379_s9 + $0x40] sm:$0xff]  }
 0xe8d   : > { %3622 = vmatmul.mubr.msk.f32.gmra.mrb[42].mxu1 %vm429_vm0, %v3605_v0  ;;  %v3608_v23 = vpop.f32.mrb[52].mxu0 }
 0xe8e   : > { %v2571_v19 = vpop.f32.mrb[53].mxu0 }
 0xe8f   : > { %v3609_v24 = vpop.f32.mrb[54].mxu0 }
 0xe90   : > { %v2574_v21 = vpop.f32.mrb[55].mxu0 }
 0xe95   : > { %v3612_v22 = vpop.f32.mrb[56].mxu0 }
 0xe96   : > { %v2587_v26 = vpop.f32.mrb[57].mxu0 }
 0xe97   : > { %v3613_v1 = vpop.f32.mrb[58].mxu0  ;;  %3628 = vmatprep.mubr.msk.f32.mxu1 %vm429_vm0, %v2587_v26 }
 0xe98   : > { %v2590_v10 = vpop.f32.mrb[59].mxu0 }
 0xe99   : > { %3629 = vmatmul.mubr.msk.f32.vlgmr.msra.gmra.mrb[44].mxu1 %vm429_vm0, %v2590_v10 }
 0xe9a   : > { %3631 = vmatprep.mubr.msk.f32.mxu1 %vm429_vm0, %v3612_v22 }
 0xe9d   : > { %3632 = vmatmul.mubr.msk.f32.gmra.mrb[46].mxu1 %vm429_vm0, %v3613_v1 }
 0xe9e   : > { %3638 = vmatprep.mubr.msk.bf16.mxu1 %vm657_vm3, %v3750_v28 }
 0xf5c   : > { %v3620_v30 = vpop.f32.mrb[40].mxu1 }
 0xf5d   : > { %v2700_v53 = vadd.f32 %v3620_v30, %v2574_v21  ;;  %v2680_v54 = vpop.f32.mrb[41].mxu1 }
 0xf5e   : > { %v2699_v7 = vadd.f32 %v2680_v54, %v2571_v19 }
 0xf60   : > { %v3623_v2 = vpop.f32.mrb[42].mxu1 }
 0xf61   : > { %v2702_v4 = vadd.f32 %v3623_v2, %v3609_v24  ;;  %v2690_v5 = vpop.f32.mrb[43].mxu1 }
 0xf62   : > { %v2701_v9 = vadd.f32 %v3608_v23, %v2690_v5 }
 0xf6c   : > { %v3630_v12 = vpop.f32.mrb[44].mxu1 }
 0xf6d   : > { %v2801_v14 = vadd.f32 %v3630_v12, %v2700_v53  ;;  %v2781_v15 = vpop.f32.mrb[45].mxu1 }
 0xf6e   : > { %v2800_v16 = vadd.f32 %v2781_v15, %v2699_v7 }
 0xf6f   : > { %v2830_v17 = vadd.f32 %v2817_v11, %v2801_v14 }
 0xf70   : > { %v2829_v18 = vadd.f32 %v2812_v13, %v2800_v16  ;;  %v3633_v25 = vpop.f32.mrb[46].mxu1 }
 0xf71   : > { %v2803_v29 = vadd.f32 %v3633_v25, %v2702_v4  ;;  %v2791_v31 = vpop.f32.mrb[47].mxu1 }
 0xf72   : > { %v2802_v33 = vadd.f32 %v2791_v31, %v2701_v9  ;;  %v2838_v34 = vpack.c.bf16 %v2830_v17, %v2829_v18 }
 0xf73   : > { %v2832_v36 = vadd.f32 %v2827_v32, %v2803_v29 }
 0xf74   : > { %v2831_v37 = vadd.f32 %v2822_v35, %v2802_v33  ;;  %3634 = vmatprep.subr.bf16.mxu1 %v2838_v34 }
 0xf75   : > { %3635 = vmatpush3.bf16.msra.mxu1 %v2838_v34 }
 0xf76   : > { %v2839_v6 = vpack.c.bf16 %v2832_v36, %v2831_v37 }
 0xf78   : > { %3636 = vmatprep.subr.bf16.mxu1 %v2839_v6 }
 0xf79   : > { %3637 = vmatpush3.bf16.msra.mxu1 %v2839_v6 }
 0xf7c   : > { %3639 = vmatmul.mubr.msk.bf16.vlgmr.msra.gmra.mrb[48].mxu1 %vm657_vm3, %v3751_v8 }
0x104f   : > { %v3640_v42 = vpop.f32.mrb[48].mxu1 }
0x1050   : > { %v2924_v43 = vadd.f32 %v3640_v42, %v2858_v41  ;;  %v2915_v44 = vpop.f32.mrb[49].mxu1 }
0x1051   : > { %v2916_v46 = vadd.f32 %v2915_v44, %v2848_v40  ;;  %v3641_v47 = vpop.f32.mrb[50].mxu1 }
0x1052   : > { %v2932_v48 = vadd.f32 %v2924_v43, %v4304_v55  ;;  %v2927_v49 = vadd.f32 %v3641_v47, %v2863_v45  ;;  %v2918_v3 = vpop.f32.mrb[51].mxu1 }
0x1053   : > { %v2930_v50 = vadd.f32 %v2916_v46, %v4296_v51  ;;  %v2919_v39 = vadd.f32 %v2918_v3, %v2853_v27 }
0x1054   : > { %v2933_v56 = vadd.f32 %v2927_v49, %v4300_v38  ;;  %v2940_v57 = vmul.f32 0.2, %v2932_v48  ;;  %vm2936_vm9 = vcmp.gt.f32.partialorder %v2932_v48, 0.0 }
0x1055   : > { %vm2934_vm3 = vcmp.gt.f32.partialorder %v2930_v50, 0.0  ;;  %v2938_v58 = vmul.f32 0.2, %v2930_v50  ;;  %v2931_v59 = vadd.f32 %v2919_v39, %v4298_v52 }
0x1056   : > { %v2941_v61 = vmul.f32 0.2, %v2933_v56  ;;  %vm2937_vm14 = vcmp.gt.f32.partialorder %v2933_v56, 0.0  ;;  %v2944_v55 = vsel %vm2936_vm9, %v2932_v48, %v2940_v57 }
0x1057   : > { %v2942_v60 = vsel %vm2934_vm3, %v2930_v50, %v2938_v58  ;;  %vm2935_vm13 = vcmp.gt.f32.partialorder %v2931_v59, 0.0  ;;  %v2939_v62 = vmul.f32 0.2, %v2931_v59  ;;  %v2949_v38 = vsel %vm429_vm0, %v2944_v55, 0.0 }
0x1058   : > { %v2946_v0 = vsel %vm429_vm0, %v2942_v60, 0.0  ;;  %v2945_v20 = vsel %vm2937_vm14, %v2933_v56, %v2941_v61 }
0x1059   : > { %v2943_v63 = vsel %vm2935_vm13, %v2931_v59, %v2939_v62  ;;  %v2951_v24 = vsel %vm429_vm0, %v2945_v20, 0.0 }
0x105a   : > { %v2947_v51 = vsel %vm429_vm0, %v2943_v63, 0.0 }
0x105b   : > { %v2948_v23 = vadd.f32 %v2947_v51, %v2946_v0 }
0x105d   : > { %v2950_v19 = vadd.f32 %v2949_v38, %v2948_v23 }
0x105f   : > { %v2952_v52 = vadd.f32 %v2951_v24, %v2950_v19 }
0x1061   : > { %2953 = vadd.xlane.f32.xlu0 %v2952_v52 }
0x10ee   : > { %v2954_v21 = vpop.xlane.xlu0 %2953 }
0x10ef   : > { %v2955_v22 = vrot.slane %v2954_v21, 4 }
0x10f1   : > { %v2956_v26 = vadd.f32 %v2955_v22, %v2954_v21 }
0x10f3   : > { %v2957_v1 = vrot.slane %v2956_v26, 2 }
0x10f5   : > { %v2958_v10 = vadd.f32 %v2957_v1, %v2956_v26 }
0x10f7   : > { %v2959_v28 = vrot.slane %v2958_v10, 1 }
0x10f9   : > { %v2960_v30 = vadd.f32 %v2959_v28, %v2958_v10 }
0x10fb   : > { %3686 = vpush %v2960_v30 }
0x112c   : > { %s3687_s28 = spop %3686 }
0x112d   : > { %s2964_s29 = smul.f32 0.001953125, %s3687_s28 }
0x112f   : > { %v2965_v53 = vstv %s2964_s29 }
0x1130   : > { %v2966_v54 = vsub.f32 %v2942_v60, %v2965_v53  ;;  %v2967_v7 = vsub.f32 %v2943_v63, %v2965_v53  ;;  %v2968_v2 = vsub.f32 %v2944_v55, %v2965_v53  ;;  %v2969_v4 = vsub.f32 %v2945_v20, %v2965_v53 }
0x1132   : > { %v2970_v5 = vmul.f32 %v2966_v54, %v2966_v54  ;;  %v2971_v9 = vmul.f32 %v2967_v7, %v2967_v7  ;;  %v2972_v11 = vmul.f32 %v2968_v2, %v2968_v2  ;;  %v2973_v12 = vmul.f32 %v2969_v4, %v2969_v4 }
0x1134   : > { %v2974_v13 = vsel %vm429_vm0, %v2970_v5, 0.0  ;;  %v2975_v14 = vsel %vm429_vm0, %v2971_v9, 0.0  ;;  %v2977_v16 = vsel %vm429_vm0, %v2972_v11, 0.0  ;;  %v2979_v18 = vsel %vm429_vm0, %v2973_v12, 0.0 }
0x1135   : > { %v2976_v15 = vadd.f32 %v2975_v14, %v2974_v13 }
0x1137   : > { %v2978_v17 = vadd.f32 %v2977_v16, %v2976_v15 }
0x1139   : > { %v2980_v25 = vadd.f32 %v2979_v18, %v2978_v17 }
0x113b   : > { %2981 = vadd.xlane.f32.xlu1 %v2980_v25 }
0x11c8   : > { %v2982_v29 = vpop.xlane.xlu1 %2981 }
0x11c9   : > { %v2983_v31 = vrot.slane %v2982_v29, 4 }
0x11cb   : > { %v2984_v32 = vadd.f32 %v2983_v31, %v2982_v29 }
0x11cd   : > { %v2985_v33 = vrot.slane %v2984_v32, 2 }
0x11cf   : > { %v2986_v34 = vadd.f32 %v2985_v33, %v2984_v32 }
0x11d1   : > { %v2987_v35 = vrot.slane %v2986_v34, 1 }
0x11d3   : > { %v2988_v36 = vadd.f32 %v2987_v35, %v2986_v34 }
0x11d5   : > { %3688 = vpush %v2988_v36 }
0x1206   : > { %s3689_s30 = spop %3688 }
0x1207   : > { %s2992_s12 = smul.f32 0.001953125, %s3689_s30 }
0x1209   : > { %s2993_s13 = sadd.f32 1e-08, %s2992_s12 }
0x120b   : > { %v2994_v37 = vstv %s2993_s13 }
0x120c   : > { %3754 = vrsqrt.f32 %v2994_v37 }
0x1216   : > { %v3755_v6 = vpop.eup %3754 }
0x1217   : > { %3690 = vpush %v3755_v6 }
0x1248   : > { %s3691_s15 = spop %3690 }
0x1249   : > { %v2997_v8 = vstv %s3691_s15 }
0x124a   : > { %v2998_v40 = vmul.f32 %v2997_v8, %v2942_v60  ;;  %v2999_v27 = vmul.f32 %v2997_v8, %v2943_v63  ;;  %v3000_v41 = vmul.f32 %v2997_v8, %v2944_v55  ;;  %v3001_v42 = vmul.f32 %v2997_v8, %v2945_v20 }
0x124c   : > { %3002 = vst.msk [vmem:[%s386_s20] sm:$0xff] %vm429_vm0, %v2998_v40  ;;  %3003 = vst.msk [vmem:[%s386_s20 + $0x8] sm:$0xff] %vm429_vm0, %v2999_v27 }
0x124d   : > { %3004 = vst.msk [vmem:[%s386_s20 + $0x10] sm:$0xff] %vm429_vm0, %v3000_v41  ;;  %3005 = vst.msk [vmem:[%s386_s20 + $0x18] sm:$0xff] %vm429_vm0, %v3001_v42 }
0x124e PF: > { %s21_s17 = sadd.s32 1, %s3762_s17  }
0x124f   : > { %p18_p4 = scmp.ge.s32.totalorder %s21_s17, 4  }
0x1251   :  { %20 = sbr.rel (!%p18_p4) target bundleno = 1 (0x1), region = 110 }

// kernel: reverse.5
= control target key start
LH: loop header
LB: loop body
LE: loop exit
PB: predicated region body
PF: predicated region fallthrough
CT: control target
= control target key end

     0   :  { %v2_v0 = vlaneseq  ;;  %s318_s0 = inlined_call_operand.vmem [shape: f32[8,1,256], index: 0, kind: input, shape index: {}]   ;;  %s319_s1 = inlined_call_operand.vmem [shape: f32[8,1,256], index: 1, kind: output, shape index: {}]  }
   0x2   :  { %v3_v1 = vsub.s32 127, %v2_v0 }
   0x4   :  { %4 = vset.pattern.permute.xlu0 %v3_v1 }
   0x5   :  { %s281_s6 = smov 0   ;;  %s283_s7 = smov 0  }
   0x6   :  { %s285_s8 = smov 0  }
   0x7 LB: > { %s211_s9 = sadd.s32 4294967295, %s269_s8   ;;  %s22_s10 = sadd.s32 1, %s265_s7  ;;  %s269_s8 = sphi %s285_s8, %s10_s8   ;;  %s265_s7 = sphi %s283_s7, %s321_s7   ;;  %s261_s6 = sphi %s281_s6, %s320_s6  }
   0x8   : > { %p23_p0 = scmp.ge.s32.totalorder %s22_s10, 2  ;;  %p213_p1 = scmp.ge.s32.totalorder %s269_s8, 2 }
   0x9   : > { %s45_s11 = sand.u32 (!%p213_p1), 1, %s269_s8   ;;  %s48_s12 = ssub.s32 (!%p213_p1), 1, %s265_s7 }
   0xa   : > { %s323_s10 = smov (%p23_p0, %s22_s10), 0  ;;  %43 = sbr.rel (%p213_p1) target bundleno = 17 (0x11), region = 16 }
   0xb   : > { %s214_s13 = sshll.u32 (!%p213_p1), %s45_s11, 3  ;;  %s215_s14 = sshll.u32 (!%p213_p1), %s48_s12, 3 }
   0xc   : > { %s54_s17 = scalar_lea.vmem (!%p213_p1), %s318_s0, %s215_s14  ;;  %s47_s18 = scalar_lea.vmem (!%p213_p1), [#allocation0], %s214_s13 }
   0xd   : > { %v82_v2 = vld [vmem:[%s54_s17] sm:$0xff] (!%p213_p1) }
   0xe   : > { %83 = vst [vmem:[%s47_s18] sm:$0xff] (!%p213_p1), %v82_v2 }
  0x11 PF: > { %p216_p2 = scmp.ge.s32.totalorder %s269_s8, 1  ;;  %p88_p3 = scmp.lt.s32.totalorder %s269_s8, 3 }
  0x13   : > { %p89_p4 = pnand %p216_p2, %p88_p3 }
  0x14   : > { %s95_s19 = sand.u32 (!%p89_p4), 1, %s211_s9   ;;  %s220_s22 = sshll.u32 (!%p89_p4), %s261_s6, 3 }
  0x15   : > { %92 = sbr.rel (%p89_p4) target bundleno = 153 (0x99), region = 54  ;;  %s217_s20 = sshll.u32 (!%p89_p4), %s95_s19, 3 }
  0x16   : > { %s97_s21 = scalar_lea.vmem (!%p89_p4), [#allocation0], %s217_s20  ;;  %s120_s25 = scalar_lea.vmem (!%p89_p4), %s319_s1, %s220_s22 }
  0x17   : > { %v107_v3 = vld [vmem:[%s97_s21] sm:$0xff] (!%p89_p4) }
  0x18   : > { %108 = vperm.xlu0 (!%p89_p4), %4, %v107_v3  }
  0x97   : > { %v109_v4 = vpop.permute.xlu0 %108 }
  0x98   : > { %149 = vst [vmem:[%s120_s25] sm:$0xff] %v109_v4 }
  0x99 PF: > { %s10_s8 = sadd.s32 1, %s269_s8   ;;  %s320_s6 = smov %s265_s7 }
  0x9a   : > { %p7_p5 = scmp.ge.s32.totalorder %s10_s8, 4   ;;  %s321_s7 = smov %s323_s10 }
  0x9c   :  { %9 = sbr.rel (!%p7_p5) target bundleno = 7 (0x7), region = 118 }

// kernel: reverse.7
= control target key start
LH: loop header
LB: loop body
LE: loop exit
PB: predicated region body
PF: predicated region fallthrough
CT: control target
= control target key end

     0   :  { %v2_v0 = vlaneseq  ;;  %s374_s0 = inlined_call_operand.vmem [shape: f32[2,4,256], index: 0, kind: input, shape index: {}]   ;;  %s375_s1 = inlined_call_operand.vmem [shape: f32[2,4,256], index: 1, kind: output, shape index: {}]  }
   0x2   :  { %v3_v1 = vsub.s32 127, %v2_v0 }
   0x4   :  { %4 = vset.pattern.permute.xlu0 %v3_v1 }
   0x5   :  { %s334_s6 = smov 0   ;;  %s336_s7 = smov 0  }
   0x6   :  { %s338_s8 = smov 0  }
   0x7 LB: > { %s262_s9 = sadd.s32 4294967295, %s322_s8   ;;  %s22_s10 = sadd.s32 1, %s318_s7  ;;  %s322_s8 = sphi %s338_s8, %s10_s8   ;;  %s318_s7 = sphi %s336_s7, %s377_s7   ;;  %s314_s6 = sphi %s334_s6, %s376_s6  }
   0x8   : > { %p23_p0 = scmp.ge.s32.totalorder %s22_s10, 2  ;;  %p264_p1 = scmp.ge.s32.totalorder %s322_s8, 2 }
   0x9   : > { %s45_s11 = sand.u32 (!%p264_p1), 1, %s322_s8   ;;  %s48_s12 = ssub.s32 (!%p264_p1), 1, %s318_s7 }
   0xa   : > { %s379_s10 = smov (%p23_p0, %s22_s10), 0  ;;  %43 = sbr.rel (%p264_p1) target bundleno = 17 (0x11), region = 16 }
   0xb   : > { %s265_s13 = sshll.u32 (!%p264_p1), %s45_s11, 3  ;;  %s266_s14 = sshll.u32 (!%p264_p1), %s48_s12, 2 }
   0xc   : > { %s55_s17 = scalar_lea.vmem (!%p264_p1), %s374_s0, %s266_s14  ;;  %s47_s18 = scalar_lea.vmem (!%p264_p1), [#allocation1], %s265_s13 }
   0xd   : > { %v71_v2 = vld [vmem:[%s55_s17] sm:$0xf] (!%p264_p1)  ;;  %v73_v3 = vld [vmem:[%s55_s17 + $0x8] sm:$0xf] (!%p264_p1) }
   0xe   : > { %72 = vst [vmem:[%s47_s18] sm:$0xf] (!%p264_p1), %v71_v2  ;;  %74 = vst [vmem:[%s47_s18 + $0x4] sm:$0xf] (!%p264_p1), %v73_v3 }
  0x11 PF: > { %p267_p2 = scmp.ge.s32.totalorder %s322_s8, 1  ;;  %p100_p3 = scmp.lt.s32.totalorder %s322_s8, 3 }
  0x13   : > { %p101_p4 = pnand %p267_p2, %p100_p3 }
  0x14   : > { %s111_s19 = sand.u32 (!%p101_p4), 1, %s262_s9   ;;  %s273_s23 = sshll.u32 (!%p101_p4), %s314_s6, 2 }
  0x15   : > { %104 = sbr.rel (%p101_p4) target bundleno = 181 (0xb5), region = 57  ;;  %s268_s20 = sshll.u32 (!%p101_p4), %s111_s19, 3 }
  0x16   : > { %s113_s21 = scalar_lea.vmem (!%p101_p4), [#allocation1], %s268_s20  ;;  %s117_s22 = scalar_lea.vmem (!%p101_p4), [#allocation3], %s268_s20 }
  0x17   : > { %v124_v4 = vld [vmem:[%s113_s21] sm:$0xf] (!%p101_p4)  ;;  %v270_v5 = vld [vmem:[%s113_s21 + $0x4] sm:$0xf] (!%p101_p4)  ;;  %s160_s26 = scalar_lea.vmem (!%p101_p4), %s375_s1, %s273_s23 }
  0x18   : > { %125 = vst [vmem:[#allocation0] sm:$0xf] (!%p101_p4), %v124_v4  ;;  %123 = vst [vmem:[#allocation0 + $0x8] sm:$0xf] (!%p101_p4), %v270_v5 }
  0x1f   : > { %v129_v6 = vld [vmem:[#allocation0] sm:$0xff]  ;;  %v135_v7 = vld [vmem:[#allocation0 + $0x8] sm:$0xff] }
  0x20   : > { %130 = vperm.xlu0 %4, %v129_v6  }
  0x24   : > { %136 = vperm.xlu0 %4, %v135_v7  }
  0x9f   : > { %v131_v8 = vpop.permute.xlu0 %130 }
  0xa0   : > { %132 = vst [vmem:[#allocation2] sm:$0xff] %v131_v8 }
  0xa3   : > { %v137_v9 = vpop.permute.xlu0 %136 }
  0xa4   : > { %138 = vst [vmem:[#allocation2 + $0x8] sm:$0xff] %v137_v9 }
  0xa7   : > { %v142_v10 = vld [vmem:[#allocation2] sm:$0xf] }
  0xa8   : > { %144 = vst [vmem:[%s117_s22] sm:$0xf] %v142_v10 }
  0xab   : > { %v146_v11 = vld [vmem:[#allocation2 + $0x8] sm:$0xf] }
  0xac   : > { %271 = vst [vmem:[%s117_s22 + $0x4] sm:$0xf] %v146_v11 }
  0xaf   : > { %v176_v12 = vld [vmem:[%s117_s22] sm:$0xf] }
  0xb0   : > { %177 = vst [vmem:[%s160_s26] sm:$0xf] %v176_v12 }
  0xb3   : > { %v178_v13 = vld [vmem:[%s117_s22 + $0x4] sm:$0xf] }
  0xb4   : > { %179 = vst [vmem:[%s160_s26 + $0x8] sm:$0xf] %v178_v13 }
  0xb5 PF: > { %s10_s8 = sadd.s32 1, %s322_s8   ;;  %s376_s6 = smov %s318_s7 }
  0xb6   : > { %p7_p5 = scmp.ge.s32.totalorder %s10_s8, 4   ;;  %s377_s7 = smov %s379_s10 }
  0xb8   :  { %9 = sbr.rel (!%p7_p5) target bundleno = 7 (0x7), region = 130 }

// kernel: summarizer_forward.7
= control target key start
LH: loop header
LB: loop body
LE: loop exit
PB: predicated region body
PF: predicated region fallthrough
CT: control target
= control target key end

     0   :  { %6 = vsyncpa [#allocation3], 0  ;;  %s557_s0 = inlined_call_operand.vmem [shape: f32[2,4,256], index: 0, kind: input, shape index: {}]   ;;  %s558_s1 = inlined_call_operand.hbm [shape: f32[2,1,256], index: 1, kind: output, shape index: {}]  }
   0x1   :  { %8 = vsyncpa [#allocation3 + $0x1], 0  ;;  %s445_s6 = smov 0   ;;  %s447_s7 = smov 0  }
   0x2   :  { %s449_s8 = smov 0   ;;  %s451_s9 = smov 0  }
   0x3   :  { %s453_s10 = smov 0   ;;  %s455_s11 = smov 0  }
   0x4 LB: > { %s281_s12 = sadd.s32 4294967295, %s431_s11   ;;  %s282_s13 = sadd.s32 4294967294, %s431_s11   ;;  %s431_s11 = sphi %s455_s11, %s14_s11   ;;  %s427_s10 = sphi %s453_s10, %s565_s10   ;;  %s423_s9 = sphi %s451_s9, %s564_s9   ;;  %s419_s8 = sphi %s449_s8, %s563_s8   ;;  %s415_s7 = sphi %s447_s7, %s562_s7   ;;  %s411_s6 = sphi %s445_s6, %s561_s6  }
   0x5   : > { %s26_s14 = sadd.s32 1, %s427_s10  ;;  %s63_s15 = sadd.s32 1, %s419_s8 }
   0x6   : > { %p28_p0 = scmp.ge.s32.totalorder %s26_s14, 2  ;;  %p73_p1 = scmp.ne.s32.totalorder %s419_s8, %s415_s7 }
   0x7   : > { %p74_p2 = scmp.eq.s32.totalorder %s281_s12, 1  ;;  %p79_p3 = scmp.ne.s32.totalorder %s415_s7, %s411_s6 }
   0x8   : > { %s567_s14 = smov (%p28_p0, %s26_s14), 0  ;;  %p80_p5 = scmp.eq.s32.totalorder %s282_s13, 1 }
   0x9   : > { %p485_p4 = por %p74_p2, %p73_p1  ;;  %s58_s17 = ssub.s32 %s427_s10, %s567_s14 }
   0xa   : > { %p285_p6 = scmp.ge.s32.totalorder %s431_s11, 1  ;;  %p61_p7 = scmp.eq.s32.totalorder %s58_s17, 0 }
   0xb   : > { %p492_p8 = por %p80_p5, %p79_p3  ;;  %p111_p9 = scmp.lt.s32.totalorder %s431_s11, 3 }
   0xc   : > { %s498_s19 = scalar_select %p61_p7, %s419_s8, %s63_s15  }
   0xd   : > { %p112_p10 = pnand %p285_p6, %p111_p9 }
   0xe   : > { %p136_p11 = scmp.lt.s32.totalorder (!%p112_p10), %s423_s9, 1  ;;  %vm150_vm0 = vcmask (!%p112_p10), 1043456   ;;  %v433_v9 = vmov (!%p112_p10), 1966171168   ;;  %v171_v11 = vlaneseq (!%p112_p10)  ;;  %s132_s25 = sand.u32 (!%p112_p10), 1, %s415_s7  }
   0xf   : > { %115 = sbr.rel (%p112_p10) target bundleno = 62 (0x3e), region = 24  ;;  %v169_v10 = vunpack.c.l.s4 (!%p112_p10), %v433_v9  ;;  %s286_s26 = sshll.u32 (!%p112_p10), %s132_s25, 1 }
  0x10   : > { %v172_v17 = vshrl.u32 (!%p112_p10), %v171_v11, 7  ;;  %s134_s27 = scalar_lea.vmem (!%p112_p10), [#allocation2], %s286_s26  ;;  %s295_s29 = sshll.u32 (!%p112_p10), %s423_s9, 5  ;;  %vm185_vm1 = vcmp.lt.s32.totalorder (!%p112_p10), %v171_v11, 256 }
  0x11   : > { %v170_v16 = vunpack.c.0.s8 (!%p112_p10), %v169_v10  ;;  %s205_s28 = sshll.u32 (!%p112_p10), %s134_s27, 4  ;;  %s512_s3 = scalar_lea.hbm (!%p112_p10), %s558_s1, %s295_s29  ;;  %s507_s28 = int_to_ptr.vmem [resolvable:$true] %s205_s28 }
  0x12   : > { %s189_s4 = scalar_lea.sflag (!%p112_p10), [#allocation3], %s132_s25  ;;  %s353_s5 = scalar_lea.vmem (!%p112_p10), %s507_s28, 32 }
  0x13   : > { %v173_v21 = vsub.s32 (!%p112_p10), %v170_v16, %v172_v17  ;;  %p354_p12 = scmp.ne.s32.totalorder (!%p112_p10), %s507_s28, %s353_s5 }
  0x15   : > { %p355_p13 = pnand (!%p112_p10), %p354_p12, %p485_p4 }
  0x16   : > { %s137_s20 = scalar_select %p136_p11, %s423_s9, 1 }
  0x17   : > { %p356_p0 = pneg %p355_p13  ;;  %s434_s9 = smov [#allocation2]  }
  0x18   : > { %s294_s21 = sshll.u32 %s137_s20, 3  ;;  %s357_s12 = sshll.u32 %s434_s9, 4  ;;  %s358_s12 = int_to_ptr.vmem [resolvable:$false] %s357_s12 }
  0x19   : > { %s143_s24 = scalar_lea.vmem %s557_s0, %s294_s21  ;;  %s359_s13 = scalar_lea.vmem %s358_s12, 64 }
  0x1a   : > { %v146_v0 = vld [vmem:[%s143_s24] sm:$0xff]  ;;  %p360_p1 = scmp.lt.s32.totalorder %s507_s28, %s358_s12  ;;  %p361_p2 = scmp.lt.s32.totalorder %s359_s13, %s353_s5 }
  0x1b   : > { %v148_v1 = vcombine.high %v146_v0, %v146_v0  ;;  %v151_v2 = vsel %vm150_vm0, %v146_v0, 0.0 }
  0x1c   : > { %v152_v3 = vrot.slane %v151_v2, 4  ;;  %p362_p3 = por %p361_p2, %p360_p1 }
  0x1d   : > { %v158_v4 = vsel %vm150_vm0, %v148_v1, 0.0 }
  0x1e   : > { %v153_v5 = vadd.f32 %v152_v3, %v151_v2  ;;  %v159_v6 = vrot.slane %v158_v4, 4  ;;  %p363_p5 = pnand %p362_p3, %p356_p0 }
  0x20   : > { %v154_v7 = vrot.slane %v153_v5, 2  ;;  %v160_v8 = vadd.f32 %v159_v6, %v158_v4 }
  0x22   : > { %v155_v12 = vadd.f32 %v154_v7, %v153_v5  ;;  %v161_v13 = vrot.slane %v160_v8, 2 }
  0x24   : > { %v156_v14 = vrot.slane %v155_v12, 1  ;;  %v162_v15 = vadd.f32 %v161_v13, %v160_v8 }
  0x26   : > { %v157_v18 = vadd.f32 %v156_v14, %v155_v12  ;;  %v163_v19 = vrot.slane %v162_v15, 1 }
  0x28   : > { %v164_v20 = vadd.f32 %v163_v19, %v162_v15 }
  0x2a   : > { %v167_v22 = vcombine.low %v157_v18, %v164_v20 }
  0x2c   : > { %v174_v23 = vrot.slane %v167_v22, %v173_v21 }
  0x2e   : > { %v181_v24 = vrot.slane %v174_v23, %v173_v21 }
  0x30   : > { %187 = vst.msk [vmem:[%s134_s27] sm:$0x3] %vm185_vm1, %v181_v24 }
  0x31   : > { %366 = shalt.err (!%p363_p5)
}
  0x32   : > { %s367_s15 = scalar_lea.hbm %s512_s3, 32  ;;  %s371_s21 = scalar_lea.hbm %s558_s1, 64 }
  0x33   : > { %p368_p6 = scmp.ne.s32.totalorder %s512_s3, %s367_s15  ;;  %p372_p10 = scmp.lt.u32.totalorder %s512_s3, %s558_s1 }
  0x34   : > { %p373_p11 = scmp.lt.u32.totalorder %s371_s21, %s367_s15  ;;  %p375_p13 = scmp.lt.u32.totalorder %s367_s15, %s512_s3 }
  0x35   : > { %p369_p7 = pnand %p368_p6, %p485_p4 }
  0x36   : > { %p374_p12 = por %p373_p11, %p372_p10 }
  0x37   : > { %p370_p9 = pneg %p369_p7 }
  0x38   : > { %p376_p0 = por %p375_p13, %p374_p12 }
  0x3a   : > { %p377_p1 = pnand %p376_p0, %p370_p9 }
  0x3c   : > { %380 = shalt.err (!%p377_p1)
}
  0x3d   : > { %296 = dma.vmem_to_hbm [thread:$0]  (%p485_p4), %s507_s28, 32, %s512_s3, %s189_s4  }
  0x3e PF: > { %p302_p2 = scmp.ge.s32.totalorder %s431_s11, 2  ;;  %s217_s24 = sand.u32 1, %s411_s6  }
  0x3f   : > { %s218_s25 = scalar_lea.sflag [#allocation3], %s217_s24 }
  0x40   : > { %p299_p3 = pnand %p302_p2, %p492_p8 }
  0x42   : > { %406 = dma.done.wait (!%p299_p3), %s218_s25, 32  }
  0x43   : > { %408 = vsyncadd (!%p299_p3), %s218_s25, 4294967264  ;;  %s14_s11 = sadd.s32 1, %s431_s11   ;;  %s561_s6 = smov %s415_s7 }
  0x44   : > { %p11_p5 = scmp.ge.s32.totalorder %s14_s11, 4   ;;  %s562_s7 = smov %s419_s8 }
  0x45   : > { %s563_s8 = smov %s498_s19  ;;  %s564_s9 = smov %s427_s10 }
  0x46   : > { %s565_s10 = smov %s567_s14  ;;  %13 = sbr.rel (!%p11_p5) target bundleno = 4 (0x4), region = 59 }
  0x4d   :  { %223 = vsyncpa [#allocation3], 1 }
  0x4e   :  { %225 = vsyncpa [#allocation3 + $0x1], 1 }

</bundles_post_ra>
